<compile_context>
chip_gen: v5e
topology: v5e:2x2
jax: 0.10.0
libtpu: 0.0.40
codegen_flags: <defaults>
</compile_context>

<pallas_src>
import math
import functools

import numpy as np
import jax
import jax.numpy as jnp
from jax.experimental import pallas as pl
from jax.experimental.pallas import tpu as pltpu

EPS = 1e-5  # nn.LayerNorm default eps


def _layernorm(x, gamma, beta):
    mu = jnp.mean(x, axis=-1, keepdims=True)
    var = jnp.mean((x - mu) ** 2, axis=-1, keepdims=True)  # biased, like torch
    return (x - mu) * jax.lax.rsqrt(var + EPS) * gamma + beta


# ----------------------------- fused TransformerBlock kernel -----------------------------
def _fused_block_kernel(x_ref, bias_ref,
                        g1_ref, b1_ref,
                        wq_ref, bq_ref, wk_ref, bk_ref, wv_ref, bv_ref,
                        wo_ref, bo_ref, g2_ref, b2_ref,
                        w1_ref, f1_ref, w2_ref, f2_ref,
                        out_ref, *rest,
                        nb, seq, m, return_weights):
    # rest = ([attnw_ref]) + (q_scratch, k_scratch, ao_scratch)
    if return_weights:
        attnw_ref = rest[0]
        q_scr, k_scr, ao_scr = rest[1:]
    else:
        attnw_ref = None
        q_scr, k_scr, ao_scr = rest

    S = seq
    x = x_ref[...]                                          # (nb*S, E) fp32
    x1 = _layernorm(x, g1_ref[...], b1_ref[...])            # norm_1

    # QKV projections with batch folded into the MXU M dimension.
    # wq/bq arrive pre-scaled by 1/sqrt(E) and (when E % S == 0) column-permuted so the
    # torch `k.view(-1, E, S)` contraction below needs no relayout of k at all.
    q_scr[...] = jnp.dot(x1, wq_ref[...], preferred_element_type=jnp.float32) + bq_ref[...]
    k_scr[...] = jnp.dot(x1, wk_ref[...], preferred_element_type=jnp.float32) + bk_ref[...]
    v = jnp.dot(x1, wv_ref[...], preferred_element_type=jnp.float32) + bv_ref[...]

    for b in range(nb):                                     # static unroll over batch rows in the chunk
        r0, r1 = b * S, (b + 1) * S
        if m is not None:
            # scores = q_b @ reshape(k_b, (E, S))  ==  sum_a  Qp_a (S,S) @ K_a (S,S)
            scores = jnp.dot(q_scr[r0:r1, 0:S], k_scr[r0:r1, 0:S],
                             preferred_element_type=jnp.float32)
            for a in range(1, m):
                scores = scores + jnp.dot(q_scr[r0:r1, a * S:(a + 1) * S],
                                          k_scr[r0:r1, a * S:(a + 1) * S],
                                          preferred_element_type=jnp.float32)
        else:
            # TODO(synk): general E % S != 0 path falls back to an in-kernel reshape.
            kt = jnp.reshape(k_scr[r0:r1, :], (k_scr.shape[1], S))
            scores = jnp.dot(q_scr[r0:r1, :], kt, preferred_element_type=jnp.float32)

        scores = scores + bias_ref[b]                       # additive mask bias, (1, S)
        mx = jnp.max(scores, axis=-1, keepdims=True)
        e = jnp.exp(scores - mx)
        inv = pl.reciprocal(jnp.sum(e, axis=-1, keepdims=True), approx=False)
        attn = e * inv                                      # softmax(dim=-1)
        if return_weights:
            attnw_ref[b] = attn
        ao_scr[r0:r1, :] = jnp.dot(attn, v[r0:r1, :], preferred_element_type=jnp.float32)

    # TODO(synk): nn.Dropout layers are identity here (eval / inference mode).
    ao = jnp.dot(ao_scr[...], wo_ref[...], preferred_element_type=jnp.float32) + bo_ref[...]
    x2 = x + ao                                             # residual 1
    x3 = _layernorm(x2, g2_ref[...], b2_ref[...])           # norm_2
    h = jnp.dot(x3, w1_ref[...], preferred_element_type=jnp.float32) + f1_ref[...]
    ff = jnp.dot(h, w2_ref[...], preferred_element_type=jnp.float32) + f2_ref[...]
    out_ref[...] = x2 + ff                                  # residual 2


# ---------------------------------- Python wrapper ---------------------------------------
def transformer_block(x, mask, params, *, return_weights=True):
    B, S, E = x.shape
    f32 = jnp.float32
    scale = 1.0 / math.sqrt(E)

    # Fold 1/sqrt(E) into the query projection; when E % S == 0 also permute its output
    # columns so the kernel can realize torch's `k.view(-1, E, S)` as a sum of contiguous
    # column-block matmuls (no k relayout, no k HBM round-trip).
    if E % S == 0:
        m = E // S
        perm = (np.arange(S)[None, :] * m + np.arange(m)[:, None]).reshape(-1)   # new col a*S+s -> old col s*m+a
        wq_eff = (params["w_q"] * scale)[:, perm]
        bq_eff = (params["b_q"] * scale)[:, perm]
    else:
        m = None
        wq_eff = params["w_q"] * scale
        bq_eff = params["b_q"] * scale

    # Fold `nb` batch rows into each grid step (M = nb*S rows for the MXU); remaining
    # chunks run as parallel grid steps (megacore-friendly when B is large).
    nb = B
    while nb > 1 and (B % nb != 0 or nb * S > 256):
        nb -= 1
    n_chunks = B // nb

    x2d = jnp.reshape(x, (B * S, E))                        # free relayout in XLA
    # Additive mask bias: 0 where attended, -1e9 where mask == 0 (same post-softmax result
    # as masked_fill for any row with at least one attended position).
    bias = jnp.where(mask == 0, f32(-1.0e9), f32(0.0)).reshape(B, 1, S)

    weights = (params["g1"], params["b1"], wq_eff, bq_eff,
               params["w_k"], params["b_k"], params["w_v"], params["b_v"],
               params["w_o"], params["b_o"], params["g2"], params["b2"],
               params["w_f1"], params["b_f1"], params["w_f2"], params["b_f2"])

    def full(arr):  # grid-invariant (weight) block: whole array, constant index map
        return pl.BlockSpec(arr.shape, lambda i: (0,) * arr.ndim)

    in_specs = [pl.BlockSpec((nb * S, E), lambda i: (i, 0)),
                pl.BlockSpec((nb, 1, S), lambda i: (i, 0, 0))] + [full(w) for w in weights]
    out_specs = [pl.BlockSpec((nb * S, E), lambda i: (i, 0))]
    out_shape = [jax.ShapeDtypeStruct((B * S, E), f32)]
    if return_weights:
        out_specs.append(pl.BlockSpec((nb, S, S), lambda i: (i, 0, 0)))
        out_shape.append(jax.ShapeDtypeStruct((B, S, S), f32))

    kern = functools.partial(_fused_block_kernel, nb=nb, seq=S, m=m,
                             return_weights=return_weights)

    results = pl.pallas_call(
        kern,
        grid=(n_chunks,),
        in_specs=in_specs,
        out_specs=out_specs,
        out_shape=out_shape,
        scratch_shapes=[pltpu.VMEM((nb * S, E), f32)] * 3,   # q, k, attn-output scratch
        compiler_params=pltpu.CompilerParams(
            dimension_semantics=("parallel",),
            vmem_limit_bytes=32 * 1024 * 1024),
    )(x2d, bias, *weights)

    if return_weights:
        out2d, attn_w = results
        return jnp.reshape(out2d, (B, S, E)), attn_w
    (out2d,) = results
    return jnp.reshape(out2d, (B, S, E)), None


# ------------------------------ deterministic parameter init -----------------------------
def init_params(key, E, d_ff=1024):
    ks = jax.random.split(key, 12)

    def lin_w(k, fan_in, fan_out):
        return jax.random.normal(k, (fan_in, fan_out), jnp.float32) / math.sqrt(fan_in)

    def lin_b(k, fan_out):
        return jax.random.normal(k, (1, fan_out), jnp.float32) * 0.01

    return {
        "g1": jnp.ones((1, E), jnp.float32), "b1": jnp.zeros((1, E), jnp.float32),
        "g2": jnp.ones((1, E), jnp.float32), "b2": jnp.zeros((1, E), jnp.float32),
        "w_q": lin_w(ks[0], E, E), "b_q": lin_b(ks[1], E),
        "w_k": lin_w(ks[2], E, E), "b_k": lin_b(ks[3], E),
        "w_v": lin_w(ks[4], E, E), "b_v": lin_b(ks[5], E),
        "w_o": lin_w(ks[6], E, E), "b_o": lin_b(ks[7], E),
        "w_f1": lin_w(ks[8], E, d_ff), "b_f1": lin_b(ks[9], d_ff),
        "w_f2": lin_w(ks[10], d_ff, E), "b_f2": lin_b(ks[11], E),
    }


# --------------------------------- pure-JAX reference ------------------------------------
def reference(x, mask, params):
    hp = jax.lax.Precision.HIGHEST

    def ln(z, g, b):
        mu = jnp.mean(z, -1, keepdims=True)
        var = jnp.mean((z - mu) ** 2, -1, keepdims=True)
        return (z - mu) / jnp.sqrt(var + EPS) * g + b

    B, S, E = x.shape
    x1 = ln(x, params["g1"], params["b1"])
    q = jnp.einsum("bse,ef->bsf", x1, params["w_q"], precision=hp) + params["b_q"]
    k = jnp.einsum("bse,ef->bsf", x1, params["w_k"], precision=hp) + params["b_k"]
    v = jnp.einsum("bse,ef->bsf", x1, params["w_v"], precision=hp) + params["b_v"]
    k_t = jnp.reshape(k, (B, E, S))                     # torch: k.view(-1, E, S)
    w = jnp.einsum("bse,bet->bst", q, k_t, precision=hp) / math.sqrt(E)
    m3 = jnp.reshape(mask, (B, 1, S))
    w = jnp.where(m3 == 0, -1.0e9, w)
    w = jax.nn.softmax(w, axis=-1)
    o = jnp.einsum("bst,bte->bse", w, v, precision=hp)
    o = jnp.einsum("bse,ef->bsf", o, params["w_o"], precision=hp) + params["b_o"]
    x2 = x + o
    x3 = ln(x2, params["g2"], params["b2"])
    h = jnp.einsum("bse,ef->bsf", x3, params["w_f1"], precision=hp) + params["b_f1"]
    ff = jnp.einsum("bsf,fe->bse", h, params["w_f2"], precision=hp) + params["b_f2"]
    return x2 + ff, w


if __name__ == "__main__":
    B, S, E = 2, 8, 32
    key = jax.random.PRNGKey(0)
    kx, kp = jax.random.split(key)

    x = jax.random.normal(kx, (B, S, E), jnp.float32)
    mask = jnp.ones((B, S), jnp.float32).at[1, 6:].set(0.0)   # last 2 tokens of batch 1 padded
    params = init_params(kp, E, d_ff=1024)

    out, attn_w = transformer_block(x, mask, params)
    jax.block_until_ready((out, attn_w))

    ref_out, ref_w = reference(x, mask, params)
    assert out.shape == (B, S, E) and attn_w.shape == (B, S, S)
    assert jnp.allclose(out, ref_out, atol=5e-3, rtol=5e-3), float(jnp.max(jnp.abs(out - ref_out)))
    assert jnp.allclose(attn_w, ref_w, atol=5e-3, rtol=5e-3), float(jnp.max(jnp.abs(attn_w - ref_w)))

    print("KERNEL_OK")
</pallas_src>

<mosaic_0001>
module attributes {stable_mosaic.version = 11 : i64} {
  func.func @_fused_block_kernel(%arg0: i32, %arg1: memref<16x32xf32, #tpu.memory_space<vmem>>, %arg2: memref<2x1x8xf32, #tpu.memory_space<vmem>>, %arg3: memref<1x32xf32, #tpu.memory_space<vmem>>, %arg4: memref<1x32xf32, #tpu.memory_space<vmem>>, %arg5: memref<32x32xf32, #tpu.memory_space<vmem>>, %arg6: memref<1x32xf32, #tpu.memory_space<vmem>>, %arg7: memref<32x32xf32, #tpu.memory_space<vmem>>, %arg8: memref<1x32xf32, #tpu.memory_space<vmem>>, %arg9: memref<32x32xf32, #tpu.memory_space<vmem>>, %arg10: memref<1x32xf32, #tpu.memory_space<vmem>>, %arg11: memref<32x32xf32, #tpu.memory_space<vmem>>, %arg12: memref<1x32xf32, #tpu.memory_space<vmem>>, %arg13: memref<1x32xf32, #tpu.memory_space<vmem>>, %arg14: memref<1x32xf32, #tpu.memory_space<vmem>>, %arg15: memref<32x1024xf32, #tpu.memory_space<vmem>>, %arg16: memref<1x1024xf32, #tpu.memory_space<vmem>>, %arg17: memref<1024x32xf32, #tpu.memory_space<vmem>>, %arg18: memref<1x32xf32, #tpu.memory_space<vmem>>, %arg19: memref<16x32xf32, #tpu.memory_space<vmem>>, %arg20: memref<2x8x8xf32, #tpu.memory_space<vmem>>, %arg21: memref<16x32xf32, #tpu.memory_space<vmem>>, %arg22: memref<16x32xf32, #tpu.memory_space<vmem>>, %arg23: memref<16x32xf32, #tpu.memory_space<vmem>>) attributes {dimension_semantics = [#tpu.dimension_semantics<parallel>], iteration_bounds = array<i64: 1>, scalar_prefetch = 0 : i64, scratch_operands = 3 : i64, tpu.core_type = #tpu.core_type<tc>, window_params = [{transform_indices = @transform_0, window_bounds = array<i64: 16, 32>}, {transform_indices = @transform_1, window_bounds = array<i64: 2, 1, 8>}, {pipeline_mode = #tpu.pipeline_mode<synchronous>, transform_indices = @transform_2, window_bounds = array<i64: 1, 32>}, {pipeline_mode = #tpu.pipeline_mode<synchronous>, transform_indices = @transform_3, window_bounds = array<i64: 1, 32>}, {pipeline_mode = #tpu.pipeline_mode<synchronous>, transform_indices = @transform_4, window_bounds = array<i64: 32, 32>}, {pipeline_mode = #tpu.pipeline_mode<synchronous>, transform_indices = @transform_5, window_bounds = array<i64: 1, 32>}, {pipeline_mode = #tpu.pipeline_mode<synchronous>, transform_indices = @transform_6, window_bounds = array<i64: 32, 32>}, {pipeline_mode = #tpu.pipeline_mode<synchronous>, transform_indices = @transform_7, window_bounds = array<i64: 1, 32>}, {pipeline_mode = #tpu.pipeline_mode<synchronous>, transform_indices = @transform_8, window_bounds = array<i64: 32, 32>}, {pipeline_mode = #tpu.pipeline_mode<synchronous>, transform_indices = @transform_9, window_bounds = array<i64: 1, 32>}, {pipeline_mode = #tpu.pipeline_mode<synchronous>, transform_indices = @transform_10, window_bounds = array<i64: 32, 32>}, {pipeline_mode = #tpu.pipeline_mode<synchronous>, transform_indices = @transform_11, window_bounds = array<i64: 1, 32>}, {pipeline_mode = #tpu.pipeline_mode<synchronous>, transform_indices = @transform_12, window_bounds = array<i64: 1, 32>}, {pipeline_mode = #tpu.pipeline_mode<synchronous>, transform_indices = @transform_13, window_bounds = array<i64: 1, 32>}, {pipeline_mode = #tpu.pipeline_mode<synchronous>, transform_indices = @transform_14, window_bounds = array<i64: 32, 1024>}, {pipeline_mode = #tpu.pipeline_mode<synchronous>, transform_indices = @transform_15, window_bounds = array<i64: 1, 1024>}, {pipeline_mode = #tpu.pipeline_mode<synchronous>, transform_indices = @transform_16, window_bounds = array<i64: 1024, 32>}, {pipeline_mode = #tpu.pipeline_mode<synchronous>, transform_indices = @transform_17, window_bounds = array<i64: 1, 32>}, {transform_indices = @transform_18, window_bounds = array<i64: 16, 32>}, {transform_indices = @transform_19, window_bounds = array<i64: 2, 8, 8>}]} {
    %c0 = arith.constant 0 : index
    %c0_0 = arith.constant 0 : index
    %0 = vector.load %arg1[%c0, %c0_0] : memref<16x32xf32, #tpu.memory_space<vmem>>, vector<16x32xf32>
    %c0_1 = arith.constant 0 : index
    %c0_2 = arith.constant 0 : index
    %1 = vector.load %arg3[%c0_1, %c0_2] : memref<1x32xf32, #tpu.memory_space<vmem>>, vector<1x32xf32>
    %c0_3 = arith.constant 0 : index
    %c0_4 = arith.constant 0 : index
    %2 = vector.load %arg4[%c0_3, %c0_4] : memref<1x32xf32, #tpu.memory_space<vmem>>, vector<1x32xf32>
    %cst = arith.constant dense<0.000000e+00> : vector<16xf32>
    %3 = vector.multi_reduction <add>, %0, %cst [1] : vector<16x32xf32> to vector<16xf32>
    %4 = vector.shape_cast %3 : vector<16xf32> to vector<16x1xf32>
    %cst_5 = arith.constant 3.200000e+01 : f32
    %5 = vector.broadcast %cst_5 : f32 to vector<16x1xf32>
    %6 = arith.divf %4, %5 : vector<16x1xf32>
    %7 = vector.broadcast %6 : vector<16x1xf32> to vector<16x32xf32>
    %8 = arith.subf %0, %7 : vector<16x32xf32>
    %9 = arith.mulf %8, %8 : vector<16x32xf32>
    %cst_6 = arith.constant dense<0.000000e+00> : vector<16xf32>
    %10 = vector.multi_reduction <add>, %9, %cst_6 [1] : vector<16x32xf32> to vector<16xf32>
    %11 = vector.shape_cast %10 : vector<16xf32> to vector<16x1xf32>
    %cst_7 = arith.constant 3.200000e+01 : f32
    %12 = vector.broadcast %cst_7 : f32 to vector<16x1xf32>
    %13 = arith.divf %11, %12 : vector<16x1xf32>
    %14 = vector.broadcast %6 : vector<16x1xf32> to vector<16x32xf32>
    %15 = arith.subf %0, %14 : vector<16x32xf32>
    %cst_8 = arith.constant 9.99999974E-6 : f32
    %16 = vector.broadcast %cst_8 : f32 to vector<16x1xf32>
    %17 = arith.addf %13, %16 : vector<16x1xf32>
    %18 = math.rsqrt %17 : vector<16x1xf32>
    %19 = vector.broadcast %18 : vector<16x1xf32> to vector<16x32xf32>
    %20 = arith.mulf %15, %19 : vector<16x32xf32>
    %21 = vector.broadcast %1 : vector<1x32xf32> to vector<16x32xf32>
    %22 = arith.mulf %20, %21 : vector<16x32xf32>
    %23 = vector.broadcast %2 : vector<1x32xf32> to vector<16x32xf32>
    %24 = arith.addf %22, %23 : vector<16x32xf32>
    %c0_9 = arith.constant 0 : index
    %c0_10 = arith.constant 0 : index
    %25 = vector.load %arg5[%c0_9, %c0_10] : memref<32x32xf32, #tpu.memory_space<vmem>>, vector<32x32xf32>
    %cst_11 = arith.constant dense<0.000000e+00> : vector<16x32xf32>
    %26 = tpu.matmul %24, %25, %cst_11 {dimension_numbers = #tpu.dot_dimension_numbers<[1], [0], [0], [1], [0, 0, 1, 1], [], []>} : vector<16x32xf32>, vector<32x32xf32>, vector<16x32xf32> -> vector<16x32xf32>
    %c0_12 = arith.constant 0 : index
    %c0_13 = arith.constant 0 : index
    %27 = vector.load %arg6[%c0_12, %c0_13] : memref<1x32xf32, #tpu.memory_space<vmem>>, vector<1x32xf32>
    %28 = vector.broadcast %27 : vector<1x32xf32> to vector<16x32xf32>
    %29 = arith.addf %26, %28 : vector<16x32xf32>
    %c0_14 = arith.constant 0 : index
    %c0_15 = arith.constant 0 : index
    %30 = vector.load %arg21[%c0_14, %c0_15] : memref<16x32xf32, #tpu.memory_space<vmem>>, vector<16x32xf32>
    tpu.vector_store %arg21[%c0_14, %c0_15], %29 {strides = array<i32>} : memref<16x32xf32, #tpu.memory_space<vmem>>, vector<16x32xf32>,
    %c0_16 = arith.constant 0 : index
    %c0_17 = arith.constant 0 : index
    %31 = vector.load %arg7[%c0_16, %c0_17] : memref<32x32xf32, #tpu.memory_space<vmem>>, vector<32x32xf32>
    %cst_18 = arith.constant dense<0.000000e+00> : vector<16x32xf32>
    %32 = tpu.matmul %24, %31, %cst_18 {dimension_numbers = #tpu.dot_dimension_numbers<[1], [0], [0], [1], [0, 0, 1, 1], [], []>} : vector<16x32xf32>, vector<32x32xf32>, vector<16x32xf32> -> vector<16x32xf32>
    %c0_19 = arith.constant 0 : index
    %c0_20 = arith.constant 0 : index
    %33 = vector.load %arg8[%c0_19, %c0_20] : memref<1x32xf32, #tpu.memory_space<vmem>>, vector<1x32xf32>
    %34 = vector.broadcast %33 : vector<1x32xf32> to vector<16x32xf32>
    %35 = arith.addf %32, %34 : vector<16x32xf32>
    %c0_21 = arith.constant 0 : index
    %c0_22 = arith.constant 0 : index
    %36 = vector.load %arg22[%c0_21, %c0_22] : memref<16x32xf32, #tpu.memory_space<vmem>>, vector<16x32xf32>
    tpu.vector_store %arg22[%c0_21, %c0_22], %35 {strides = array<i32>} : memref<16x32xf32, #tpu.memory_space<vmem>>, vector<16x32xf32>,
    %c0_23 = arith.constant 0 : index
    %c0_24 = arith.constant 0 : index
    %37 = vector.load %arg9[%c0_23, %c0_24] : memref<32x32xf32, #tpu.memory_space<vmem>>, vector<32x32xf32>
    %cst_25 = arith.constant dense<0.000000e+00> : vector<16x32xf32>
    %38 = tpu.matmul %24, %37, %cst_25 {dimension_numbers = #tpu.dot_dimension_numbers<[1], [0], [0], [1], [0, 0, 1, 1], [], []>} : vector<16x32xf32>, vector<32x32xf32>, vector<16x32xf32> -> vector<16x32xf32>
    %c0_26 = arith.constant 0 : index
    %c0_27 = arith.constant 0 : index
    %39 = vector.load %arg10[%c0_26, %c0_27] : memref<1x32xf32, #tpu.memory_space<vmem>>, vector<1x32xf32>
    %40 = vector.broadcast %39 : vector<1x32xf32> to vector<16x32xf32>
    %41 = arith.addf %38, %40 : vector<16x32xf32>
    %c0_28 = arith.constant 0 : index
    %c0_29 = arith.constant 0 : index
    %42 = vector.load %arg21[%c0_28, %c0_29] : memref<16x32xf32, #tpu.memory_space<vmem>>, vector<8x8xf32>
    %c0_30 = arith.constant 0 : index
    %c0_31 = arith.constant 0 : index
    %43 = vector.load %arg22[%c0_30, %c0_31] : memref<16x32xf32, #tpu.memory_space<vmem>>, vector<8x8xf32>
    %cst_32 = arith.constant dense<0.000000e+00> : vector<8x8xf32>
    %44 = tpu.matmul %42, %43, %cst_32 {dimension_numbers = #tpu.dot_dimension_numbers<[1], [0], [0], [1], [0, 0, 1, 1], [], []>} : vector<8x8xf32>, vector<8x8xf32>, vector<8x8xf32> -> vector<8x8xf32>
    %c0_33 = arith.constant 0 : index
    %c8 = arith.constant 8 : index
    %45 = vector.load %arg21[%c0_33, %c8] : memref<16x32xf32, #tpu.memory_space<vmem>>, vector<8x8xf32>
    %c0_34 = arith.constant 0 : index
    %c8_35 = arith.constant 8 : index
    %46 = vector.load %arg22[%c0_34, %c8_35] : memref<16x32xf32, #tpu.memory_space<vmem>>, vector<8x8xf32>
    %cst_36 = arith.constant dense<0.000000e+00> : vector<8x8xf32>
    %47 = tpu.matmul %45, %46, %cst_36 {dimension_numbers = #tpu.dot_dimension_numbers<[1], [0], [0], [1], [0, 0, 1, 1], [], []>} : vector<8x8xf32>, vector<8x8xf32>, vector<8x8xf32> -> vector<8x8xf32>
    %48 = arith.addf %44, %47 : vector<8x8xf32>
    %c0_37 = arith.constant 0 : index
    %c16 = arith.constant 16 : index
    %49 = vector.load %arg21[%c0_37, %c16] : memref<16x32xf32, #tpu.memory_space<vmem>>, vector<8x8xf32>
    %c0_38 = arith.constant 0 : index
    %c16_39 = arith.constant 16 : index
    %50 = vector.load %arg22[%c0_38, %c16_39] : memref<16x32xf32, #tpu.memory_space<vmem>>, vector<8x8xf32>
    %cst_40 = arith.constant dense<0.000000e+00> : vector<8x8xf32>
    %51 = tpu.matmul %49, %50, %cst_40 {dimension_numbers = #tpu.dot_dimension_numbers<[1], [0], [0], [1], [0, 0, 1, 1], [], []>} : vector<8x8xf32>, vector<8x8xf32>, vector<8x8xf32> -> vector<8x8xf32>
    %52 = arith.addf %48, %51 : vector<8x8xf32>
    %c0_41 = arith.constant 0 : index
    %c24 = arith.constant 24 : index
    %53 = vector.load %arg21[%c0_41, %c24] : memref<16x32xf32, #tpu.memory_space<vmem>>, vector<8x8xf32>
    %c0_42 = arith.constant 0 : index
    %c24_43 = arith.constant 24 : index
    %54 = vector.load %arg22[%c0_42, %c24_43] : memref<16x32xf32, #tpu.memory_space<vmem>>, vector<8x8xf32>
    %cst_44 = arith.constant dense<0.000000e+00> : vector<8x8xf32>
    %55 = tpu.matmul %53, %54, %cst_44 {dimension_numbers = #tpu.dot_dimension_numbers<[1], [0], [0], [1], [0, 0, 1, 1], [], []>} : vector<8x8xf32>, vector<8x8xf32>, vector<8x8xf32> -> vector<8x8xf32>
    %56 = arith.addf %52, %55 : vector<8x8xf32>
    %c0_45 = arith.constant 0 : index
    %c0_46 = arith.constant 0 : index
    %c0_47 = arith.constant 0 : index
    %57 = vector.load %arg2[%c0_45, %c0_46, %c0_47] : memref<2x1x8xf32, #tpu.memory_space<vmem>>, vector<1x1x8xf32>
    %58 = vector.shape_cast %57 : vector<1x1x8xf32> to vector<1x8xf32>
    %59 = vector.broadcast %58 : vector<1x8xf32> to vector<8x8xf32>
    %60 = arith.addf %56, %59 : vector<8x8xf32>
    %cst_48 = arith.constant dense<0xFF800000> : vector<8xf32>
    %61 = vector.multi_reduction <maximumf>, %60, %cst_48 [1] : vector<8x8xf32> to vector<8xf32>
    %62 = vector.shape_cast %61 : vector<8xf32> to vector<8x1xf32>
    %63 = vector.broadcast %62 : vector<8x1xf32> to vector<8x8xf32>
    %64 = arith.subf %60, %63 : vector<8x8xf32>
    %65 = math.exp %64 : vector<8x8xf32>
    %cst_49 = arith.constant dense<0.000000e+00> : vector<8xf32>
    %66 = vector.multi_reduction <add>, %65, %cst_49 [1] : vector<8x8xf32> to vector<8xf32>
    %67 = vector.shape_cast %66 : vector<8xf32> to vector<8x1xf32>
    %68 = tpu.reciprocal %67 : vector<8x1xf32> -> vector<8x1xf32>
    %69 = vector.broadcast %68 : vector<8x1xf32> to vector<8x8xf32>
    %70 = arith.mulf %65, %69 : vector<8x8xf32>
    %c0_50 = arith.constant 0 : index
    %c0_51 = arith.constant 0 : index
    %c0_52 = arith.constant 0 : index
    %71 = vector.load %arg20[%c0_50, %c0_51, %c0_52] : memref<2x8x8xf32, #tpu.memory_space<vmem>>, vector<1x8x8xf32>
    %72 = vector.shape_cast %71 : vector<1x8x8xf32> to vector<8x8xf32>
    %73 = vector.shape_cast %70 : vector<8x8xf32> to vector<1x8x8xf32>
    tpu.vector_store %arg20[%c0_50, %c0_51, %c0_52], %73 {strides = array<i32>} : memref<2x8x8xf32, #tpu.memory_space<vmem>>, vector<1x8x8xf32>,
    %74 = vector.extract_strided_slice %41 {offsets = [0, 0], sizes = [8, 32], strides = [1, 1]} : vector<16x32xf32> to vector<8x32xf32>
    %cst_53 = arith.constant dense<0.000000e+00> : vector<8x32xf32>
    %75 = tpu.matmul %70, %74, %cst_53 {dimension_numbers = #tpu.dot_dimension_numbers<[1], [0], [0], [1], [0, 0, 1, 1], [], []>} : vector<8x8xf32>, vector<8x32xf32>, vector<8x32xf32> -> vector<8x32xf32>
    %c0_54 = arith.constant 0 : index
    %c0_55 = arith.constant 0 : index
    %76 = vector.load %arg23[%c0_54, %c0_55] : memref<16x32xf32, #tpu.memory_space<vmem>>, vector<8x32xf32>
    tpu.vector_store %arg23[%c0_54, %c0_55], %75 {strides = array<i32>} : memref<16x32xf32, #tpu.memory_space<vmem>>, vector<8x32xf32>,
    %c8_56 = arith.constant 8 : index
    %c0_57 = arith.constant 0 : index
    %77 = vector.load %arg21[%c8_56, %c0_57] : memref<16x32xf32, #tpu.memory_space<vmem>>, vector<8x8xf32>
    %c8_58 = arith.constant 8 : index
    %c0_59 = arith.constant 0 : index
    %78 = vector.load %arg22[%c8_58, %c0_59] : memref<16x32xf32, #tpu.memory_space<vmem>>, vector<8x8xf32>
    %cst_60 = arith.constant dense<0.000000e+00> : vector<8x8xf32>
    %79 = tpu.matmul %77, %78, %cst_60 {dimension_numbers = #tpu.dot_dimension_numbers<[1], [0], [0], [1], [0, 0, 1, 1], [], []>} : vector<8x8xf32>, vector<8x8xf32>, vector<8x8xf32> -> vector<8x8xf32>
    %c8_61 = arith.constant 8 : index
    %c8_62 = arith.constant 8 : index
    %80 = vector.load %arg21[%c8_61, %c8_62] : memref<16x32xf32, #tpu.memory_space<vmem>>, vector<8x8xf32>
    %c8_63 = arith.constant 8 : index
    %c8_64 = arith.constant 8 : index
    %81 = vector.load %arg22[%c8_63, %c8_64] : memref<16x32xf32, #tpu.memory_space<vmem>>, vector<8x8xf32>
    %cst_65 = arith.constant dense<0.000000e+00> : vector<8x8xf32>
    %82 = tpu.matmul %80, %81, %cst_65 {dimension_numbers = #tpu.dot_dimension_numbers<[1], [0], [0], [1], [0, 0, 1, 1], [], []>} : vector<8x8xf32>, vector<8x8xf32>, vector<8x8xf32> -> vector<8x8xf32>
    %83 = arith.addf %79, %82 : vector<8x8xf32>
    %c8_66 = arith.constant 8 : index
    %c16_67 = arith.constant 16 : index
    %84 = vector.load %arg21[%c8_66, %c16_67] : memref<16x32xf32, #tpu.memory_space<vmem>>, vector<8x8xf32>
    %c8_68 = arith.constant 8 : index
    %c16_69 = arith.constant 16 : index
    %85 = vector.load %arg22[%c8_68, %c16_69] : memref<16x32xf32, #tpu.memory_space<vmem>>, vector<8x8xf32>
    %cst_70 = arith.constant dense<0.000000e+00> : vector<8x8xf32>
    %86 = tpu.matmul %84, %85, %cst_70 {dimension_numbers = #tpu.dot_dimension_numbers<[1], [0], [0], [1], [0, 0, 1, 1], [], []>} : vector<8x8xf32>, vector<8x8xf32>, vector<8x8xf32> -> vector<8x8xf32>
    %87 = arith.addf %83, %86 : vector<8x8xf32>
    %c8_71 = arith.constant 8 : index
    %c24_72 = arith.constant 24 : index
    %88 = vector.load %arg21[%c8_71, %c24_72] : memref<16x32xf32, #tpu.memory_space<vmem>>, vector<8x8xf32>
    %c8_73 = arith.constant 8 : index
    %c24_74 = arith.constant 24 : index
    %89 = vector.load %arg22[%c8_73, %c24_74] : memref<16x32xf32, #tpu.memory_space<vmem>>, vector<8x8xf32>
    %cst_75 = arith.constant dense<0.000000e+00> : vector<8x8xf32>
    %90 = tpu.matmul %88, %89, %cst_75 {dimension_numbers = #tpu.dot_dimension_numbers<[1], [0], [0], [1], [0, 0, 1, 1], [], []>} : vector<8x8xf32>, vector<8x8xf32>, vector<8x8xf32> -> vector<8x8xf32>
    %91 = arith.addf %87, %90 : vector<8x8xf32>
    %c1 = arith.constant 1 : index
    %c0_76 = arith.constant 0 : index
    %c0_77 = arith.constant 0 : index
    %92 = vector.load %arg2[%c1, %c0_76, %c0_77] : memref<2x1x8xf32, #tpu.memory_space<vmem>>, vector<1x1x8xf32>
    %93 = vector.shape_cast %92 : vector<1x1x8xf32> to vector<1x8xf32>
    %94 = vector.broadcast %93 : vector<1x8xf32> to vector<8x8xf32>
    %95 = arith.addf %91, %94 : vector<8x8xf32>
    %cst_78 = arith.constant dense<0xFF800000> : vector<8xf32>
    %96 = vector.multi_reduction <maximumf>, %95, %cst_78 [1] : vector<8x8xf32> to vector<8xf32>
    %97 = vector.shape_cast %96 : vector<8xf32> to vector<8x1xf32>
    %98 = vector.broadcast %97 : vector<8x1xf32> to vector<8x8xf32>
    %99 = arith.subf %95, %98 : vector<8x8xf32>
    %100 = math.exp %99 : vector<8x8xf32>
    %cst_79 = arith.constant dense<0.000000e+00> : vector<8xf32>
    %101 = vector.multi_reduction <add>, %100, %cst_79 [1] : vector<8x8xf32> to vector<8xf32>
    %102 = vector.shape_cast %101 : vector<8xf32> to vector<8x1xf32>
    %103 = tpu.reciprocal %102 : vector<8x1xf32> -> vector<8x1xf32>
    %104 = vector.broadcast %103 : vector<8x1xf32> to vector<8x8xf32>
    %105 = arith.mulf %100, %104 : vector<8x8xf32>
    %c1_80 = arith.constant 1 : index
    %c0_81 = arith.constant 0 : index
    %c0_82 = arith.constant 0 : index
    %106 = vector.load %arg20[%c1_80, %c0_81, %c0_82] : memref<2x8x8xf32, #tpu.memory_space<vmem>>, vector<1x8x8xf32>
    %107 = vector.shape_cast %106 : vector<1x8x8xf32> to vector<8x8xf32>
    %108 = vector.shape_cast %105 : vector<8x8xf32> to vector<1x8x8xf32>
    tpu.vector_store %arg20[%c1_80, %c0_81, %c0_82], %108 {strides = array<i32>} : memref<2x8x8xf32, #tpu.memory_space<vmem>>, vector<1x8x8xf32>,
    %109 = vector.extract_strided_slice %41 {offsets = [8, 0], sizes = [8, 32], strides = [1, 1]} : vector<16x32xf32> to vector<8x32xf32>
    %cst_83 = arith.constant dense<0.000000e+00> : vector<8x32xf32>
    %110 = tpu.matmul %105, %109, %cst_83 {dimension_numbers = #tpu.dot_dimension_numbers<[1], [0], [0], [1], [0, 0, 1, 1], [], []>} : vector<8x8xf32>, vector<8x32xf32>, vector<8x32xf32> -> vector<8x32xf32>
    %c8_84 = arith.constant 8 : index
    %c0_85 = arith.constant 0 : index
    %111 = vector.load %arg23[%c8_84, %c0_85] : memref<16x32xf32, #tpu.memory_space<vmem>>, vector<8x32xf32>
    tpu.vector_store %arg23[%c8_84, %c0_85], %110 {strides = array<i32>} : memref<16x32xf32, #tpu.memory_space<vmem>>, vector<8x32xf32>,
    %c0_86 = arith.constant 0 : index
    %c0_87 = arith.constant 0 : index
    %112 = vector.load %arg23[%c0_86, %c0_87] : memref<16x32xf32, #tpu.memory_space<vmem>>, vector<16x32xf32>
    %c0_88 = arith.constant 0 : index
    %c0_89 = arith.constant 0 : index
    %113 = vector.load %arg11[%c0_88, %c0_89] : memref<32x32xf32, #tpu.memory_space<vmem>>, vector<32x32xf32>
    %cst_90 = arith.constant dense<0.000000e+00> : vector<16x32xf32>
    %114 = tpu.matmul %112, %113, %cst_90 {dimension_numbers = #tpu.dot_dimension_numbers<[1], [0], [0], [1], [0, 0, 1, 1], [], []>} : vector<16x32xf32>, vector<32x32xf32>, vector<16x32xf32> -> vector<16x32xf32>
    %c0_91 = arith.constant 0 : index
    %c0_92 = arith.constant 0 : index
    %115 = vector.load %arg12[%c0_91, %c0_92] : memref<1x32xf32, #tpu.memory_space<vmem>>, vector<1x32xf32>
    %116 = vector.broadcast %115 : vector<1x32xf32> to vector<16x32xf32>
    %117 = arith.addf %114, %116 : vector<16x32xf32>
    %118 = arith.addf %0, %117 : vector<16x32xf32>
    %c0_93 = arith.constant 0 : index
    %c0_94 = arith.constant 0 : index
    %119 = vector.load %arg13[%c0_93, %c0_94] : memref<1x32xf32, #tpu.memory_space<vmem>>, vector<1x32xf32>
    %c0_95 = arith.constant 0 : index
    %c0_96 = arith.constant 0 : index
    %120 = vector.load %arg14[%c0_95, %c0_96] : memref<1x32xf32, #tpu.memory_space<vmem>>, vector<1x32xf32>
    %cst_97 = arith.constant dense<0.000000e+00> : vector<16xf32>
    %121 = vector.multi_reduction <add>, %118, %cst_97 [1] : vector<16x32xf32> to vector<16xf32>
    %122 = vector.shape_cast %121 : vector<16xf32> to vector<16x1xf32>
    %cst_98 = arith.constant 3.200000e+01 : f32
    %123 = vector.broadcast %cst_98 : f32 to vector<16x1xf32>
    %124 = arith.divf %122, %123 : vector<16x1xf32>
    %125 = vector.broadcast %124 : vector<16x1xf32> to vector<16x32xf32>
    %126 = arith.subf %118, %125 : vector<16x32xf32>
    %127 = arith.mulf %126, %126 : vector<16x32xf32>
    %cst_99 = arith.constant dense<0.000000e+00> : vector<16xf32>
    %128 = vector.multi_reduction <add>, %127, %cst_99 [1] : vector<16x32xf32> to vector<16xf32>
    %129 = vector.shape_cast %128 : vector<16xf32> to vector<16x1xf32>
    %cst_100 = arith.constant 3.200000e+01 : f32
    %130 = vector.broadcast %cst_100 : f32 to vector<16x1xf32>
    %131 = arith.divf %129, %130 : vector<16x1xf32>
    %132 = vector.broadcast %124 : vector<16x1xf32> to vector<16x32xf32>
    %133 = arith.subf %118, %132 : vector<16x32xf32>
    %cst_101 = arith.constant 9.99999974E-6 : f32
    %134 = vector.broadcast %cst_101 : f32 to vector<16x1xf32>
    %135 = arith.addf %131, %134 : vector<16x1xf32>
    %136 = math.rsqrt %135 : vector<16x1xf32>
    %137 = vector.broadcast %136 : vector<16x1xf32> to vector<16x32xf32>
    %138 = arith.mulf %133, %137 : vector<16x32xf32>
    %139 = vector.broadcast %119 : vector<1x32xf32> to vector<16x32xf32>
    %140 = arith.mulf %138, %139 : vector<16x32xf32>
    %141 = vector.broadcast %120 : vector<1x32xf32> to vector<16x32xf32>
    %142 = arith.addf %140, %141 : vector<16x32xf32>
    %c0_102 = arith.constant 0 : index
    %c0_103 = arith.constant 0 : index
    %143 = vector.load %arg15[%c0_102, %c0_103] : memref<32x1024xf32, #tpu.memory_space<vmem>>, vector<32x1024xf32>
    %cst_104 = arith.constant dense<0.000000e+00> : vector<16x1024xf32>
    %144 = tpu.matmul %142, %143, %cst_104 {dimension_numbers = #tpu.dot_dimension_numbers<[1], [0], [0], [1], [0, 0, 1, 1], [], []>} : vector<16x32xf32>, vector<32x1024xf32>, vector<16x1024xf32> -> vector<16x1024xf32>
    %c0_105 = arith.constant 0 : index
    %c0_106 = arith.constant 0 : index
    %145 = vector.load %arg16[%c0_105, %c0_106] : memref<1x1024xf32, #tpu.memory_space<vmem>>, vector<1x1024xf32>
    %146 = vector.broadcast %145 : vector<1x1024xf32> to vector<16x1024xf32>
    %147 = arith.addf %144, %146 : vector<16x1024xf32>
    %c0_107 = arith.constant 0 : index
    %c0_108 = arith.constant 0 : index
    %148 = vector.load %arg17[%c0_107, %c0_108] : memref<1024x32xf32, #tpu.memory_space<vmem>>, vector<1024x32xf32>
    %cst_109 = arith.constant dense<0.000000e+00> : vector<16x32xf32>
    %149 = tpu.matmul %147, %148, %cst_109 {dimension_numbers = #tpu.dot_dimension_numbers<[1], [0], [0], [1], [0, 0, 1, 1], [], []>} : vector<16x1024xf32>, vector<1024x32xf32>, vector<16x32xf32> -> vector<16x32xf32>
    %c0_110 = arith.constant 0 : index
    %c0_111 = arith.constant 0 : index
    %150 = vector.load %arg18[%c0_110, %c0_111] : memref<1x32xf32, #tpu.memory_space<vmem>>, vector<1x32xf32>
    %151 = vector.broadcast %150 : vector<1x32xf32> to vector<16x32xf32>
    %152 = arith.addf %149, %151 : vector<16x32xf32>
    %153 = arith.addf %118, %152 : vector<16x32xf32>
    %c0_112 = arith.constant 0 : index
    %c0_113 = arith.constant 0 : index
    %154 = vector.load %arg19[%c0_112, %c0_113] : memref<16x32xf32, #tpu.memory_space<vmem>>, vector<16x32xf32>
    tpu.vector_store %arg19[%c0_112, %c0_113], %153 {strides = array<i32>} : memref<16x32xf32, #tpu.memory_space<vmem>>, vector<16x32xf32>,
    return
  }
  func.func @transform_0(%arg0: i32) -> (i32, i32) {
    %c0_i32 = arith.constant 0 : i32
    %c0_i32_0 = arith.constant 0 : i32
    return %arg0, %c0_i32 : i32, i32
  }
  func.func @transform_1(%arg0: i32) -> (i32, i32, i32) {
    %c0_i32 = arith.constant 0 : i32
    %c0_i32_0 = arith.constant 0 : i32
    %c0_i32_1 = arith.constant 0 : i32
    return %arg0, %c0_i32, %c0_i32_0 : i32, i32, i32
  }
  func.func @transform_2(%arg0: i32) -> (i32, i32) {
    %c0_i32 = arith.constant 0 : i32
    %c0_i32_0 = arith.constant 0 : i32
    %c0_i32_1 = arith.constant 0 : i32
    return %c0_i32, %c0_i32_0 : i32, i32
  }
  func.func @transform_3(%arg0: i32) -> (i32, i32) {
    %c0_i32 = arith.constant 0 : i32
    %c0_i32_0 = arith.constant 0 : i32
    %c0_i32_1 = arith.constant 0 : i32
    return %c0_i32, %c0_i32_0 : i32, i32
  }
  func.func @transform_4(%arg0: i32) -> (i32, i32) {
    %c0_i32 = arith.constant 0 : i32
    %c0_i32_0 = arith.constant 0 : i32
    %c0_i32_1 = arith.constant 0 : i32
    return %c0_i32, %c0_i32_0 : i32, i32
  }
  func.func @transform_5(%arg0: i32) -> (i32, i32) {
    %c0_i32 = arith.constant 0 : i32
    %c0_i32_0 = arith.constant 0 : i32
    %c0_i32_1 = arith.constant 0 : i32
    return %c0_i32, %c0_i32_0 : i32, i32
  }
  func.func @transform_6(%arg0: i32) -> (i32, i32) {
    %c0_i32 = arith.constant 0 : i32
    %c0_i32_0 = arith.constant 0 : i32
    %c0_i32_1 = arith.constant 0 : i32
    return %c0_i32, %c0_i32_0 : i32, i32
  }
  func.func @transform_7(%arg0: i32) -> (i32, i32) {
    %c0_i32 = arith.constant 0 : i32
    %c0_i32_0 = arith.constant 0 : i32
    %c0_i32_1 = arith.constant 0 : i32
    return %c0_i32, %c0_i32_0 : i32, i32
  }
  func.func @transform_8(%arg0: i32) -> (i32, i32) {
    %c0_i32 = arith.constant 0 : i32
    %c0_i32_0 = arith.constant 0 : i32
    %c0_i32_1 = arith.constant 0 : i32
    return %c0_i32, %c0_i32_0 : i32, i32
  }
  func.func @transform_9(%arg0: i32) -> (i32, i32) {
    %c0_i32 = arith.constant 0 : i32
    %c0_i32_0 = arith.constant 0 : i32
    %c0_i32_1 = arith.constant 0 : i32
    return %c0_i32, %c0_i32_0 : i32, i32
  }
  func.func @transform_10(%arg0: i32) -> (i32, i32) {
    %c0_i32 = arith.constant 0 : i32
    %c0_i32_0 = arith.constant 0 : i32
    %c0_i32_1 = arith.constant 0 : i32
    return %c0_i32, %c0_i32_0 : i32, i32
  }
  func.func @transform_11(%arg0: i32) -> (i32, i32) {
    %c0_i32 = arith.constant 0 : i32
    %c0_i32_0 = arith.constant 0 : i32
    %c0_i32_1 = arith.constant 0 : i32
    return %c0_i32, %c0_i32_0 : i32, i32
  }
  func.func @transform_12(%arg0: i32) -> (i32, i32) {
    %c0_i32 = arith.constant 0 : i32
    %c0_i32_0 = arith.constant 0 : i32
    %c0_i32_1 = arith.constant 0 : i32
    return %c0_i32, %c0_i32_0 : i32, i32
  }
  func.func @transform_13(%arg0: i32) -> (i32, i32) {
    %c0_i32 = arith.constant 0 : i32
    %c0_i32_0 = arith.constant 0 : i32
    %c0_i32_1 = arith.constant 0 : i32
    return %c0_i32, %c0_i32_0 : i32, i32
  }
  func.func @transform_14(%arg0: i32) -> (i32, i32) {
    %c0_i32 = arith.constant 0 : i32
    %c0_i32_0 = arith.constant 0 : i32
    %c0_i32_1 = arith.constant 0 : i32
    return %c0_i32, %c0_i32_0 : i32, i32
  }
  func.func @transform_15(%arg0: i32) -> (i32, i32) {
    %c0_i32 = arith.constant 0 : i32
    %c0_i32_0 = arith.constant 0 : i32
    %c0_i32_1 = arith.constant 0 : i32
    return %c0_i32, %c0_i32_0 : i32, i32
  }
  func.func @transform_16(%arg0: i32) -> (i32, i32) {
    %c0_i32 = arith.constant 0 : i32
    %c0_i32_0 = arith.constant 0 : i32
    %c0_i32_1 = arith.constant 0 : i32
    return %c0_i32, %c0_i32_0 : i32, i32
  }
  func.func @transform_17(%arg0: i32) -> (i32, i32) {
    %c0_i32 = arith.constant 0 : i32
    %c0_i32_0 = arith.constant 0 : i32
    %c0_i32_1 = arith.constant 0 : i32
    return %c0_i32, %c0_i32_0 : i32, i32
  }
  func.func @transform_18(%arg0: i32) -> (i32, i32) {
    %c0_i32 = arith.constant 0 : i32
    %c0_i32_0 = arith.constant 0 : i32
    return %arg0, %c0_i32 : i32, i32
  }
  func.func @transform_19(%arg0: i32) -> (i32, i32, i32) {
    %c0_i32 = arith.constant 0 : i32
    %c0_i32_0 = arith.constant 0 : i32
    %c0_i32_1 = arith.constant 0 : i32
    return %arg0, %c0_i32, %c0_i32_0 : i32, i32, i32
  }
}

</mosaic_0001>

<bundles_post_ra>
// kernel: tpu_custom_call.1
= control target key start
LH: loop header
LB: loop body
LE: loop exit
PB: predicated region body
PF: predicated region fallthrough
CT: control target
= control target key end

     0   :  { %s2227_s0 = inlined_call_operand.vmem [shape: f32[16,32], index: 0, kind: input, shape index: {}]   ;;  %s2228_s1 = inlined_call_operand.vmem [shape: f32[2,1,8], index: 1, kind: input, shape index: {}]   ;;  %s2229_s2 = inlined_call_operand.vmem [shape: f32[1,32], index: 2, kind: input, shape index: {}]   ;;  %s2230_s3 = inlined_call_operand.vmem [shape: f32[1,32], index: 3, kind: input, shape index: {}]   ;;  %s2231_s4 = inlined_call_operand.vmem [shape: f32[32,32], index: 4, kind: input, shape index: {}]   ;;  %s2232_s5 = inlined_call_operand.vmem [shape: f32[1,32], index: 5, kind: input, shape index: {}]   ;;  %s2233_s6 = inlined_call_operand.vmem [shape: f32[32,32], index: 6, kind: input, shape index: {}]   ;;  %s2234_s7 = inlined_call_operand.vmem [shape: f32[1,32], index: 7, kind: input, shape index: {}]   ;;  %s2235_s8 = inlined_call_operand.vmem [shape: f32[32,32], index: 8, kind: input, shape index: {}]   ;;  %s2236_s9 = inlined_call_operand.vmem [shape: f32[1,32], index: 9, kind: input, shape index: {}]   ;;  %s2237_s10 = inlined_call_operand.vmem [shape: f32[32,32], index: 10, kind: input, shape index: {}]   ;;  %s2238_s11 = inlined_call_operand.vmem [shape: f32[1,32], index: 11, kind: input, shape index: {}]   ;;  %s2239_s12 = inlined_call_operand.vmem [shape: f32[1,32], index: 12, kind: input, shape index: {}]   ;;  %s2240_s13 = inlined_call_operand.vmem [shape: f32[1,32], index: 13, kind: input, shape index: {}]   ;;  %s2241_s14 = inlined_call_operand.vmem [shape: f32[32,1024], index: 14, kind: input, shape index: {}]   ;;  %s2242_s15 = inlined_call_operand.vmem [shape: f32[1,1024], index: 15, kind: input, shape index: {}]   ;;  %s2243_s16 = inlined_call_operand.vmem [shape: f32[1024,32], index: 16, kind: input, shape index: {}]   ;;  %s2244_s17 = inlined_call_operand.vmem [shape: f32[1,32], index: 17, kind: input, shape index: {}]   ;;  %s2245_s18 = inlined_call_operand.hbm [shape: f32[16,32], index: 18, kind: output, shape index: {0}]   ;;  %s2246_s19 = inlined_call_operand.hbm [shape: f32[2,8,8], index: 19, kind: output, shape index: {1}]  }
   0x1   :  { %2249 = sst [smem:[#allocation11_spill]] %s2227_s0 }
   0x2   :  { %2250 = sst [smem:[#allocation12_spill]] %s2228_s1 }
   0x3   :  { %2251 = sst [smem:[#allocation13_spill]] %s2229_s2 }
   0x4   :  { %2252 = sst [smem:[#allocation14_spill]] %s2230_s3 }
   0x5   :  { %25 = vsyncpa [#allocation6], 0  ;;  %s2253_s20 = sld [smem:[#allocation11_spill]]  ;;  %vm67_vm0 = vcmask 261120  }
   0xb   :  { %v1489_v0 = vld [vmem:[%s2253_s20] sm:$0xff]  ;;  %v1494_v1 = vld [vmem:[%s2253_s20 + $0x8] sm:$0xff] }
   0xc   :  { %v68_v2 = vsel %vm67_vm0, %v1489_v0, 0.0  ;;  %v71_v3 = vsel %vm67_vm0, %v1494_v1, 0.0 }
   0xd   :  { %69 = vadd.xlane.f32.xlu0 %v68_v2  ;;  %72 = vadd.xlane.f32.xlu1 %v71_v3 }
   0xe   :  { %26 = vsyncpa [#allocation8], 0  ;;  %v1378_v4 = vmov 32.0   ;;  %v132_v21 = vld [vmem:[%s2231_s4 + $0x18] sm:$0xff]  ;;  %v131_v24 = vld [vmem:[%s2231_s4 + $0x10] sm:$0xff]  ;;  %s2255_s30 = sld [smem:[#allocation14_spill]] }
   0xf   :  { %1308 = vrcp.f32 %v1378_v4  ;;  %v171_v22 = vld [vmem:[%s2233_s6 + $0x18] sm:$0xff]  ;;  %155 = vmatpush.msra.mxu0 %v132_v21  ;;  %v170_v25 = vld [vmem:[%s2233_s6 + $0x10] sm:$0xff]  ;;  %v130_v27 = vld [vmem:[%s2231_s4 + $0x8] sm:$0xff]  ;;  %vm241_vm8 = vcmask 64512   ;;  %s2256_s3 = sld [smem:[#allocation12_spill]]  ;;  %s1384_s29 = smov 8  }
  0x10   :  { %v204_v23 = vld [vmem:[%s2235_s8 + $0x18] sm:$0xff]  ;;  %188 = vmatpush.msra.mxu1 %v171_v22  ;;  %v203_v26 = vld [vmem:[%s2235_s8 + $0x10] sm:$0xff]  ;;  %v169_v28 = vld [vmem:[%s2233_s6 + $0x8] sm:$0xff] }
  0x11   :  { %221 = vmatpush.msra.mxu2 %v204_v23  ;;  %156 = vmatpush.msra.mxu0 %v131_v24  ;;  %v202_v29 = vld [vmem:[%s2235_s8 + $0x8] sm:$0xff]  ;;  %v129_v30 = vld [vmem:[%s2231_s4] sm:$0xff] }
  0x12   :  { %189 = vmatpush.msra.mxu1 %v170_v25  ;;  %v168_v31 = vld [vmem:[%s2233_s6] sm:$0xff]  ;;  %s1237_s6 = sshll.u32 %s2246_s19, 4  ;;  %s1238_s6 = int_to_ptr.hbm [resolvable:$true] %s1237_s6 }
  0x13   :  { %222 = vmatpush.msra.mxu2 %v203_v26  ;;  %157 = vmatpush.msra.mxu0 %v130_v27  ;;  %v201_v32 = vld [vmem:[%s2235_s8] sm:$0xff]  ;;  %s2254_s8 = sld [smem:[#allocation13_spill]] }
  0x14   :  { %190 = vmatpush.msra.mxu1 %v169_v28  ;;  %v1298_v55 = vld [vmem:[%s2255_s30] ss:$0 sm:$0xff] }
  0x15   :  { %v1309_v5 = vpop.eup %1308  ;;  %223 = vmatpush.msra.mxu2 %v202_v29  ;;  %158 = vmatpush.msra.mxu0 %v129_v30  ;;  %v1299_v61 = vld [vmem:[%s2232_s5] ss:$0 sm:$0xff]  ;;  %s1379_s5 = smov 112  }
  0x16   :  { %v75_v6 = vmul.f32 32.0, %v1309_v5  ;;  %vm79_vm1 = vweird.f32 %v1309_v5  ;;  %191 = vmatpush.msra.mxu1 %v168_v31  ;;  %v1300_v62 = vld [vmem:[%s2234_s7] ss:$0 sm:$0xff]  ;;  %s1380_s7 = smov 120  }
  0x17   :  { %224 = vmatpush.msra.mxu2 %v201_v32 }
  0x18   :  { %v76_v7 = vsub.f32 1.0, %v75_v6 }
  0x19   :  { %v1297_v51 = vld [vmem:[%s2254_s8] ss:$0 sm:$0xff]  ;;  %s1383_s8 = smov 128  }
  0x1a   :  { %v77_v8 = vmul.f32 %v1309_v5, %v76_v7 }
  0x1c   :  { %v78_v9 = vadd.f32 %v1309_v5, %v77_v8 }
  0x1e   :  { %v1500_v10 = vsel %vm79_vm1, %v1309_v5, %v78_v9  ;;  %v1301_v5 = vld [vmem:[%s2236_s9] ss:$0 sm:$0xff]  ;;  %s1381_s9 = smov 104  }
  0x80   :  { %v70_v11 = vpop.xlane.xlu0 %69  ;;  %v73_v12 = vpop.xlane.xlu1 %72 }
  0x81   :  { %v81_v13 = vmul.f32 %v1500_v10, %v70_v11  ;;  %v82_v14 = vmul.f32 %v1500_v10, %v73_v12 }
  0x83   :  { %v83_v15 = vsub.f32 %v1489_v0, %v81_v13  ;;  %v1506_v16 = vsub.f32 %v1494_v1, %v82_v14 }
  0x85   :  { %v85_v17 = vmul.f32 %v83_v15, %v83_v15  ;;  %v86_v18 = vmul.f32 %v1506_v16, %v1506_v16 }
  0x87   :  { %v87_v19 = vsel %vm67_vm0, %v85_v17, 0.0  ;;  %v90_v20 = vsel %vm67_vm0, %v86_v18, 0.0 }
  0x88   :  { %88 = vadd.xlane.f32.xlu0 %v87_v19  ;;  %91 = vadd.xlane.f32.xlu1 %v90_v20 }
  0xfb   :  { %v89_v33 = vpop.xlane.xlu0 %88  ;;  %v92_v34 = vpop.xlane.xlu1 %91 }
  0xfc   :  { %v93_v35 = vmul.f32 %v89_v33, %v1500_v10  ;;  %v94_v36 = vmul.f32 %v92_v34, %v1500_v10 }
  0xfe   :  { %v95_v37 = vadd.f32 1e-05, %v93_v35  ;;  %v96_v38 = vadd.f32 1e-05, %v94_v36  ;;  %v1302_v35 = vld [vmem:[%s2256_s3] ss:$0 sm:$0xff] }
 0x100   :  { %1310 = vrsqrt.f32 %v95_v37  ;;  %vm113_vm2 = vweird.f32 %v96_v38  ;;  %vm103_vm5 = vweird.f32 %v95_v37 }
 0x101   :  { %1312 = vrsqrt.f32 %v96_v38 }
 0x106   :  { %v1311_v39 = vpop.eup %1310 }
 0x107   :  { %v1313_v40 = vpop.eup %1312  ;;  %v98_v41 = vmul.f32 %v1311_v39, %v95_v37  ;;  %vm104_vm4 = vweird.f32 %v1311_v39 }
 0x108   :  { %v108_v42 = vmul.f32 %v1313_v40, %v96_v38  ;;  %vm114_vm3 = vweird.f32 %v1313_v40  ;;  %vm105_vm7 = vmor %vm103_vm5, %vm104_vm4 }
 0x109   :  { %v99_v43 = vmul.f32 %v1311_v39, %v98_v41  ;;  %vm115_vm6 = vmor %vm113_vm2, %vm114_vm3 }
 0x10a   :  { %v109_v44 = vmul.f32 %v1313_v40, %v108_v42 }
 0x10b   :  { %v100_v45 = vmul.f32 0.5, %v99_v43 }
 0x10c   :  { %v110_v46 = vmul.f32 0.5, %v109_v44 }
 0x10d   :  { %v101_v47 = vsub.f32 1.5, %v100_v45 }
 0x10e   :  { %v111_v48 = vsub.f32 1.5, %v110_v46 }
 0x10f   :  { %v102_v49 = vmul.f32 %v1311_v39, %v101_v47 }
 0x110   :  { %v112_v50 = vmul.f32 %v1313_v40, %v111_v48 }
 0x111   :  { %v106_v52 = vsel %vm105_vm7, %v1311_v39, %v102_v49 }
 0x112   :  { %v116_v53 = vsel %vm115_vm6, %v1313_v40, %v112_v50  ;;  %v117_v54 = vmul.f32 %v106_v52, %v83_v15 }
 0x113   :  { %v118_v57 = vmul.f32 %v116_v53, %v1506_v16 }
 0x114   :  { %v122_v56 = vmul.f32 %v1297_v51, %v117_v54 }
 0x115   :  { %v123_v59 = vmul.f32 %v1297_v51, %v118_v57 }
 0x116   :  { %v127_v58 = vadd.f32 %v1298_v55, %v122_v56 }
 0x117   :  { %v128_v60 = vadd.f32 %v1298_v55, %v123_v59  ;;  %v565_v59 = vld [vmem:[%s2237_s10 + $0x10] sm:$0xff] }
 0x118   :  { %1254 = vmatmul.msk.f32.vlgmr.msra.gmra.mxu0 %vm67_vm0, %v127_v58  ;;  %1256 = vmatmul.msk.f32.vlgmr.msra.gmra.mxu1 %vm67_vm0, %v127_v58 }
 0x119   :  { %1258 = vmatmul.msk.f32.vlgmr.msra.gmra.mxu2 %vm67_vm0, %v127_v58  ;;  %v566_v58 = vld [vmem:[%s2237_s10 + $0x18] sm:$0xff] }
 0x120   :  { %1257 = vmatmul.msk.f32.gmra.mxu1 %vm67_vm0, %v128_v60  ;;  %1255 = vmatmul.msk.f32.gmra.mxu0 %vm67_vm0, %v128_v60 }
 0x121   :  { %1259 = vmatmul.msk.f32.gmra.mxu2 %vm67_vm0, %v128_v60  ;;  %v564_v60 = vld [vmem:[%s2237_s10 + $0x8] sm:$0xff] }
 0x195   :  { %v160_v63 = vpop.f32.mrf.mxu0  ;;  %v193_v2 = vpop.f32.mrf.mxu1 }
 0x196   :  { %v161_v3 = vadd.f32 %v1299_v61, %v160_v63  ;;  %v194_v4 = vadd.f32 %v1300_v62, %v193_v2 }
 0x198   :  { %166 = vst.msk [vmem:[#allocation2] sm:$0xff] %vm67_vm0, %v161_v3 }
 0x199   :  { %199 = vst.msk [vmem:[#allocation3] sm:$0xff] %vm67_vm0, %v194_v4 }
 0x19c   :  { %v226_v6 = vpop.f32.mrf.mxu2 }
 0x19d   :  { %v227_v7 = vadd.f32 %v1301_v5, %v226_v6  ;;  %v196_v8 = vpop.f32.mrf.mxu1  ;;  %v163_v9 = vpop.f32.mrf.mxu0  ;;  %v1303_v6 = vld [vmem:[%s2256_s3 + $0x1] ss:$0 sm:$0xff] }
 0x19e   :  { %v197_v11 = vadd.f32 %v1300_v62, %v196_v8  ;;  %v164_v12 = vadd.f32 %v1299_v61, %v163_v9  ;;  %v563_v61 = vld [vmem:[%s2237_s10] sm:$0xff] }
 0x19f   :  { %390 = vmatpush.msrb.mxu1 %v227_v7  ;;  %v232_v13 = vld [vmem:[#allocation2] sm:$0xff] }
 0x1a0   :  { %200 = vst.msk [vmem:[#allocation3 + $0x8] sm:$0xff] %vm67_vm0, %v197_v11  ;;  %v233_v14 = vld [vmem:[#allocation3] sm:$0xff]  ;;  %286 = vrot.lane.b32.xlu1 %v232_v13, %s1379_s5  ;;  %235 = vrot.lane.b32.xlu0 %v232_v13, %s1380_s7 }
 0x1a1   :  { %238 = vrot.lane.b32.xlu2 %v233_v14, %s1380_s7  ;;  %281 = vmatpush.msra.mxu3 %v233_v14  ;;  %167 = vst.msk [vmem:[#allocation2 + $0x8] sm:$0xff] %vm67_vm0, %v164_v12 }
 0x1a2   :  { %1261 = vmatmul.msk.f32.vlgmr.msra.gmra.mxu3 %vm241_vm8, %v232_v13 }
 0x1a4   :  { %v229_v22 = vpop.f32.mrf.mxu2 }
 0x1a5   :  { %v230_v23 = vadd.f32 %v1301_v5, %v229_v22 }
 0x1a7   :  { %v397_v15 = vld [vmem:[#allocation3 + $0x8] sm:$0xff] }
 0x1a8   :  { %402 = vrot.lane.b32.xlu1 %v397_v15, %s1380_s7  ;;  %v396_v16 = vld [vmem:[#allocation2 + $0x8] sm:$0xff] }
 0x1a9   :  { %288 = vrot.lane.b32.xlu2 %v233_v14, %s1379_s5 }
 0x1b0   :  { %399 = vrot.lane.b32.xlu1 %v396_v16, %s1380_s7 }
 0x1b1   :  { %316 = vrot.lane.b32.xlu2 %v233_v14, %s1381_s9 }
 0x1b8   :  { %451 = vrot.lane.b32.xlu1 %v397_v15, %s1379_s5 }
 0x1b9   :  { %314 = vrot.lane.b32.xlu2 %v232_v13, %s1381_s9 }
 0x1c0   :  { %449 = vrot.lane.b32.xlu1 %v396_v16, %s1379_s5 }
 0x1c8   :  { %479 = vrot.lane.b32.xlu1 %v397_v15, %s1381_s9 }
 0x1fb   :  { %v239_v17 = vpop.permute.xlu2 %238 }
 0x1fc   :  { %259 = vmatpush.msrb.mxu0 %v239_v17 }
 0x203   :  { %v289_v18 = vpop.permute.xlu2 %288 }
 0x204   :  { %308 = vmatpush.msrb.mxu3 %v289_v18 }
 0x206   :  { %444 = vmatpush.msra.mxu3 %v397_v15 }
 0x20b   :  { %v317_v19 = vpop.permute.xlu2 %316 }
 0x20c   :  { %336 = vmatpush.msra.mxu0 %v317_v19 }
 0x212   :  { %v287_v20 = vpop.permute.xlu1 %286  ;;  %v236_v21 = vpop.permute.xlu0 %235 }
 0x213   :  { %1260 = vmatmul.msk.f32.vlgmr.msrb.gmra.mxu0 %vm241_vm8, %v236_v21  ;;  %1262 = vmatmul.msk.f32.vlgmr.msrb.gmra.mxu3 %vm241_vm8, %v287_v20  ;;  %v315_v24 = vpop.permute.xlu2 %314 }
 0x214   :  { %589 = vmatpush.msrb.mxu3 %v566_v58 }
 0x216   :  { %590 = vmatpush.msrb.mxu3 %v565_v59 }
 0x218   :  { %591 = vmatpush.msrb.mxu3 %v564_v60 }
 0x21a   :  { %v403_v25 = vpop.permute.xlu1 %402  ;;  %592 = vmatpush.msrb.mxu3 %v563_v61 }
 0x21b   :  { %1263 = vmatmul.msk.f32.vlgmr.msra.gmra.mxu0 %vm241_vm8, %v315_v24  ;;  %422 = vmatpush.msrb.mxu2 %v403_v25 }
 0x21c   :  { %1266 = vmatmul.msk.f32.vlgmr.msra.gmra.mxu3 %vm241_vm8, %v396_v16 }
 0x21d   :  { %555 = vmatpush.msra.mxu2 %v230_v23 }
 0x222   :  { %v400_v26 = vpop.permute.xlu1 %399 }
 0x223   :  { %1265 = vmatmul.msk.f32.vlgmr.msrb.gmra.mxu2 %vm241_vm8, %v400_v26 }
 0x225   :  { %v283_v30 = vpop.f32.mrf.mxu3 }
 0x22a   :  { %v452_v27 = vpop.permute.xlu1 %451 }
 0x22b   :  { %471 = vmatpush.msrb.mxu0 %v452_v27 }
 0x232   :  { %v450_v28 = vpop.permute.xlu1 %449 }
 0x233   :  { %1267 = vmatmul.msk.f32.vlgmr.msrb.gmra.mxu0 %vm241_vm8, %v450_v28 }
 0x23a   :  { %v480_v29 = vpop.permute.xlu1 %479 }
 0x23b   :  { %499 = vmatpush.msra.mxu1 %v480_v29 }
 0x290   :  { %v261_v31 = vpop.f32.mrf.mxu0 }
 0x291   :  { %v284_v32 = vadd.f32 %v283_v30, %v261_v31 }
 0x296   :  { %v310_v33 = vpop.f32.mrf.mxu3 }
 0x297   :  { %v313_v34 = vadd.f32 %v310_v33, %v284_v32 }
 0x298   :  { %v338_v36 = vpop.f32.mrf.mxu0 }
 0x299   :  { %v341_v37 = vadd.f32 %v338_v36, %v313_v34 }
 0x29b   :  { %v346_v38 = vadd.f32 %v1302_v35, %v341_v37 }
 0x29d   :  { %v347_v39 = vsel %vm241_vm8, %v346_v38, -inf }
 0x29e   :  { %348 = vmax.xlane.f32.xlu2 %v347_v39  ;;  %v682_v39 = vld [vmem:[%s2241_s14 + $0xc0] sm:$0xff] }
 0x29f   :  { %v446_v2 = vpop.f32.mrf.mxu3  ;;  %726 = vmatpush.msra.mxu0 %v682_v39  ;;  %v912_v39 = vld [vmem:[%s2243_s16 + $0x70] sm:$0xff] }
 0x2a6   :  { %v424_v63 = vpop.f32.mrf.mxu2 }
 0x2a7   :  { %v447_v4 = vadd.f32 %v446_v2, %v424_v63  ;;  %v1686_v2 = vld [vmem:[%s2239_s12] ss:$0 sm:$0xff] }
 0x2b0   :  { %v473_v3 = vpop.f32.mrf.mxu0 }
 0x2b1   :  { %v476_v5 = vadd.f32 %v473_v3, %v447_v4  ;;  %v1691_v4 = vld [vmem:[%s2240_s13] ss:$0 sm:$0xff] }
 0x2b6   :  { %477 = vrot.lane.b32.xlu2 %v396_v16, %s1381_s9  ;;  %v1616_v16 = vld [vmem:[%s2238_s11] ss:$0 sm:$0xff] }
 0x311   :  { %v349_v40 = vpop.xlane.xlu2 %348 }
 0x312   :  { %v350_v41 = vsub.f32 %v346_v38, %v349_v40  ;;  %v683_v40 = vld [vmem:[%s2241_s14 + $0xc8] sm:$0xff] }
 0x314   :  { %v351_v42 = vmul.f32 1.442695, %v350_v41  ;;  %v684_v41 = vld [vmem:[%s2241_s14 + $0xd0] sm:$0xff] }
 0x315   :  { %772 = vmatpush.msrb.mxu2 %v684_v41  ;;  %v944_v41 = vld [vmem:[%s2243_s16 + $0x170] sm:$0xff] }
 0x316   :  { %1314 = vpow2.f32 %v351_v42  ;;  %v674_v42 = vld [vmem:[%s2241_s14 + $0x80] sm:$0xff] }
 0x317   :  { %727 = vmatpush.msra.mxu0 %v674_v42  ;;  %v960_v42 = vld [vmem:[%s2243_s16 + $0x1f0] sm:$0xff] }
 0x319   :  { %v478_v57 = vpop.permute.xlu2 %477 }
 0x31c   :  { %v1315_v43 = vpop.eup %1314 }
 0x31d   :  { %v353_v44 = vsel %vm241_vm8, %v1315_v43, 0.0 }
 0x31e   :  { %354 = vadd.xlane.f32.xlu0 %v353_v44  ;;  %v676_v44 = vld [vmem:[%s2241_s14 + $0x90] sm:$0xff] }
 0x31f   :  { %773 = vmatpush.msrb.mxu2 %v676_v44  ;;  %v927_v44 = vld [vmem:[%s2243_s16 + $0xe8] sm:$0xff] }
 0x391   :  { %v355_v45 = vpop.xlane.xlu0 %354 }
 0x392   :  { %1316 = vrcp.f32 %v355_v45  ;;  %v367_v49 = vand.u32 2147483648, %v355_v45  ;;  %v365_v51 = vand.u32 2147483647, %v355_v45  ;;  %vm361_vm10 = vweird.f32 %v355_v45 }
 0x394   :  { %v368_v53 = vor.u32 1.1754944e-38, %v367_v49  ;;  %vm366_vm12 = vcmp.eq.f32.partialorder %v365_v51, 8.507059e+37  ;;  %v659_v49 = vld [vmem:[%s2241_s14 + $0x8] sm:$0xff] }
 0x398   :  { %v1317_v46 = vpop.eup %1316 }
 0x399   :  { %v357_v47 = vmul.f32 %v1317_v46, %v355_v45  ;;  %vm362_vm9 = vweird.f32 %v1317_v46  ;;  %v666_v45 = vld [vmem:[%s2241_s14 + $0x40] sm:$0xff] }
 0x39a   :  { %vm363_vm11 = vmor %vm361_vm10, %vm362_vm9  ;;  %728 = vmatpush.msra.mxu0 %v666_v45  ;;  %v943_v45 = vld [vmem:[%s2243_s16 + $0x168] sm:$0xff] }
 0x39b   :  { %v358_v48 = vsub.f32 1.0, %v357_v47  ;;  %v668_v47 = vld [vmem:[%s2241_s14 + $0x50] sm:$0xff] }
 0x39c   :  { %774 = vmatpush.msrb.mxu2 %v668_v47  ;;  %v910_v47 = vld [vmem:[%s2243_s16 + $0x60] sm:$0xff] }
 0x39d   :  { %v359_v50 = vmul.f32 %v1317_v46, %v358_v48  ;;  %v658_v48 = vld [vmem:[%s2241_s14] sm:$0xff] }
 0x39e   :  { %729 = vmatpush.msra.mxu0 %v658_v48  ;;  %v926_v48 = vld [vmem:[%s2243_s16 + $0xe0] sm:$0xff] }
 0x39f   :  { %v360_v52 = vadd.f32 %v1317_v46, %v359_v50  ;;  %v660_v50 = vld [vmem:[%s2241_s14 + $0x10] sm:$0xff] }
 0x3a0   :  { %775 = vmatpush.msrb.mxu2 %v660_v50  ;;  %v958_v50 = vld [vmem:[%s2243_s16 + $0x1e0] sm:$0xff] }
 0x3a1   :  { %v364_v54 = vsel %vm363_vm11, %v1317_v46, %v360_v52  ;;  %v667_v46 = vld [vmem:[%s2241_s14 + $0x48] sm:$0xff] }
 0x3a2   :  { %v369_v55 = vsel %vm366_vm12, %v368_v53, %v364_v54  ;;  %v685_v53 = vld [vmem:[%s2241_s14 + $0xd8] sm:$0xff] }
 0x3a3   :  { %v370_v56 = vmul.f32 %v1315_v43, %v369_v55  ;;  %v675_v43 = vld [vmem:[%s2241_s14 + $0x88] sm:$0xff]  ;;  %v677_v54 = vld [vmem:[%s2241_s14 + $0x98] sm:$0xff]  ;;  %795 = vmatpush.msra.mxu3 %v685_v53 }
 0x3a4   :  { %v941_v53 = vld [vmem:[%s2243_s16 + $0x158] sm:$0xff] }
 0x3a5   :  { %371 = vst.msk [vmem:[#allocation7] sm:$0xff] %vm241_vm8, %v370_v56  ;;  %1264 = vmatmul.msk.f32.vlgmr.msrb.gmra.mxu1 %vm241_vm8, %v370_v56  ;;  %v669_v56 = vld [vmem:[%s2241_s14 + $0x58] sm:$0xff]  ;;  %796 = vmatpush.msra.mxu3 %v677_v54 }
 0x3a6   :  { %749 = vmatpush.msrb.mxu1 %v683_v40  ;;  %v928_v40 = vld [vmem:[%s2243_s16 + $0xf0] sm:$0xff]  ;;  %v957_v54 = vld [vmem:[%s2243_s16 + $0x1d8] sm:$0xff] }
 0x3a7   :  { %797 = vmatpush.msra.mxu3 %v669_v56  ;;  %v924_v56 = vld [vmem:[%s2243_s16 + $0xd0] sm:$0xff] }
 0x3a8   :  { %750 = vmatpush.msrb.mxu1 %v675_v43  ;;  %v911_v43 = vld [vmem:[%s2243_s16 + $0x68] sm:$0xff] }
 0x3aa   :  { %751 = vmatpush.msrb.mxu1 %v667_v46  ;;  %v959_v46 = vld [vmem:[%s2243_s16 + $0x1e8] sm:$0xff] }
 0x3ac   :  { %752 = vmatpush.msrb.mxu1 %v659_v49  ;;  %v942_v49 = vld [vmem:[%s2243_s16 + $0x160] sm:$0xff] }
 0x3ad   :  { %1268 = vmatmul.msk.f32.vlgmr.msra.gmra.mxu1 %vm241_vm8, %v478_v57  ;;  %v661_v57 = vld [vmem:[%s2241_s14 + $0x18] sm:$0xff] }
 0x3ae   :  { %798 = vmatpush.msra.mxu3 %v661_v57 }
 0x422   :  { %v392_v62 = vpop.f32.mrf.mxu1 }
 0x423   :  { %395 = vst.msk [vmem:[#allocation4] sm:$0xff] %vm67_vm0, %v392_v62 }
 0x42a   :  { %v501_v7 = vpop.f32.mrf.mxu1  ;;  %v561_v8 = vld [vmem:[#allocation4] sm:$0xff] }
 0x42b   :  { %v504_v9 = vadd.f32 %v501_v7, %v476_v5  ;;  %1271 = vmatmul.msk.f32.vlgmr.msrb.gmra.mxu3 %vm67_vm0, %v561_v8 }
 0x42d   :  { %v510_v11 = vadd.f32 %v1303_v6, %v504_v9 }
 0x42f   :  { %v511_v12 = vsel %vm241_vm8, %v510_v11, -inf }
 0x430   :  { %512 = vmax.xlane.f32.xlu0 %v511_v12 }
 0x4a3   :  { %v513_v13 = vpop.xlane.xlu0 %512 }
 0x4a4   :  { %v514_v14 = vsub.f32 %v510_v11, %v513_v13 }
 0x4a6   :  { %v515_v15 = vmul.f32 1.442695, %v514_v14 }
 0x4a8   :  { %1318 = vpow2.f32 %v515_v15 }
 0x4ae   :  { %v1319_v17 = vpop.eup %1318  ;;  %v594_v18 = vpop.f32.mrf.mxu3 }
 0x4af   :  { %v595_v19 = vadd.f32 %v1616_v16, %v594_v18  ;;  %v517_v20 = vsel %vm241_vm8, %v1319_v17, 0.0 }
 0x4b0   :  { %518 = vadd.xlane.f32.xlu1 %v517_v20 }
 0x4b1   :  { %v1621_v21 = vadd.f32 %v595_v19, %v1489_v0 }
 0x4b3   :  { %v604_v22 = vsel %vm67_vm0, %v1621_v21, 0.0 }
 0x4b4   :  { %605 = vadd.xlane.f32.xlu0 %v604_v22  ;;  %v688_v22 = vld [vmem:[%s2241_s14 + $0xf0] sm:$0xff] }
 0x523   :  { %v519_v23 = vpop.xlane.xlu1 %518 }
 0x524   :  { %1320 = vrcp.f32 %v519_v23  ;;  %v531_v0 = vand.u32 2147483648, %v519_v23  ;;  %v529_v33 = vand.u32 2147483647, %v519_v23  ;;  %vm525_vm14 = vweird.f32 %v519_v23 }
 0x526   :  { %v532_v35 = vor.u32 1.1754944e-38, %v531_v0  ;;  %vm530_vm1 = vcmp.eq.f32.partialorder %v529_v33, 8.507059e+37  ;;  %v673_v0 = vld [vmem:[%s2241_s14 + $0x78] sm:$0xff]  ;;  %v664_v33 = vld [vmem:[%s2241_s14 + $0x30] sm:$0xff] }
 0x527   :  { %v606_v24 = vpop.xlane.xlu0 %605 }
 0x528   :  { %v610_v25 = vmul.f32 %v606_v24, %v1500_v10  ;;  %v678_v24 = vld [vmem:[%s2241_s14 + $0xa0] sm:$0xff] }
 0x52a   :  { %v1321_v26 = vpop.eup %1320  ;;  %v1627_v27 = vsub.f32 %v1621_v21, %v610_v25  ;;  %v679_v25 = vld [vmem:[%s2241_s14 + $0xa8] sm:$0xff] }
 0x52b   :  { %v521_v28 = vmul.f32 %v1321_v26, %v519_v23  ;;  %vm526_vm13 = vweird.f32 %v1321_v26  ;;  %v689_v23 = vld [vmem:[%s2241_s14 + $0xf8] sm:$0xff] }
 0x52c   :  { %v614_v29 = vmul.f32 %v1627_v27, %v1627_v27  ;;  %vm527_vm15 = vmor %vm525_vm14, %vm526_vm13  ;;  %887 = vmatpush.msrb.mxu3 %v689_v23  ;;  %v935_v23 = vld [vmem:[%s2243_s16 + $0x128] sm:$0xff] }
 0x52d   :  { %v522_v30 = vsub.f32 1.0, %v521_v28  ;;  %v670_v28 = vld [vmem:[%s2241_s14 + $0x60] sm:$0xff] }
 0x52e   :  { %v616_v31 = vsel %vm67_vm0, %v614_v29, 0.0  ;;  %v671_v29 = vld [vmem:[%s2241_s14 + $0x68] sm:$0xff] }
 0x52f   :  { %v523_v32 = vmul.f32 %v1321_v26, %v522_v30  ;;  %617 = vadd.xlane.f32.xlu2 %v616_v31  ;;  %v672_v30 = vld [vmem:[%s2241_s14 + $0x70] sm:$0xff]  ;;  %v662_v31 = vld [vmem:[%s2241_s14 + $0x20] sm:$0xff] }
 0x531   :  { %v524_v34 = vadd.f32 %v1321_v26, %v523_v32  ;;  %v663_v32 = vld [vmem:[%s2241_s14 + $0x28] sm:$0xff] }
 0x533   :  { %v528_v36 = vsel %vm527_vm15, %v1321_v26, %v524_v34  ;;  %v680_v26 = vld [vmem:[%s2241_s14 + $0xb0] sm:$0xff]  ;;  %v665_v34 = vld [vmem:[%s2241_s14 + $0x38] sm:$0xff] }
 0x534   :  { %v533_v37 = vsel %vm530_vm1, %v532_v35, %v528_v36  ;;  %v913_v35 = vld [vmem:[%s2243_s16 + $0x78] sm:$0xff] }
 0x535   :  { %v534_v38 = vmul.f32 %v1319_v17, %v533_v37  ;;  %v929_v36 = vld [vmem:[%s2243_s16 + $0xf8] sm:$0xff] }
 0x536   :  { %v945_v37 = vld [vmem:[%s2243_s16 + $0x178] sm:$0xff] }
 0x537   :  { %536 = vst.msk [vmem:[#allocation7 + $0x8] sm:$0xff] %vm241_vm8, %v534_v38  ;;  %1270 = vmatmul.msk.f32.vlgmr.msra.gmra.mxu2 %vm241_vm8, %v534_v38  ;;  %v961_v38 = vld [vmem:[%s2243_s16 + $0x1f8] sm:$0xff] }
 0x538   :  { %864 = vmatpush.msra.mxu2 %v688_v22  ;;  %v919_v22 = vld [vmem:[%s2243_s16 + $0xa8] sm:$0xff] }
 0x53a   :  { %865 = vmatpush.msra.mxu2 %v680_v26  ;;  %v902_v26 = vld [vmem:[%s2243_s16 + $0x20] sm:$0xff] }
 0x53c   :  { %866 = vmatpush.msra.mxu2 %v672_v30  ;;  %v950_v30 = vld [vmem:[%s2243_s16 + $0x1a0] sm:$0xff] }
 0x53e   :  { %867 = vmatpush.msra.mxu2 %v664_v33  ;;  %v933_v33 = vld [vmem:[%s2243_s16 + $0x118] sm:$0xff] }
 0x5a2   :  { %v618_v51 = vpop.xlane.xlu2 %617 }
 0x5a3   :  { %v622_v52 = vmul.f32 %v618_v51, %v1500_v10  ;;  %v909_v51 = vld [vmem:[%s2243_s16 + $0x58] sm:$0xff] }
 0x5a5   :  { %v624_v55 = vadd.f32 1e-05, %v622_v52  ;;  %v925_v52 = vld [vmem:[%s2243_s16 + $0xd8] sm:$0xff] }
 0x5a7   :  { %1322 = vrsqrt.f32 %v624_v55  ;;  %vm632_vm3 = vweird.f32 %v624_v55 }
 0x5ad   :  { %v1323_v58 = vpop.eup %1322 }
 0x5ae   :  { %v627_v59 = vmul.f32 %v1323_v58, %v624_v55  ;;  %vm633_vm2 = vweird.f32 %v1323_v58  ;;  %v908_v55 = vld [vmem:[%s2243_s16 + $0x50] sm:$0xff] }
 0x5af   :  { %vm634_vm4 = vmor %vm632_vm3, %vm633_vm2 }
 0x5b0   :  { %v628_v60 = vmul.f32 %v1323_v58, %v627_v59  ;;  %v956_v59 = vld [vmem:[%s2243_s16 + $0x1d0] sm:$0xff] }
 0x5b2   :  { %v629_v61 = vmul.f32 0.5, %v628_v60 }
 0x5b4   :  { %v630_v62 = vsub.f32 1.5, %v629_v61  ;;  %v907_v61 = vld [vmem:[%s2243_s16 + $0x48] sm:$0xff] }
 0x5b6   :  { %v631_v63 = vmul.f32 %v1323_v58, %v630_v62  ;;  %v923_v62 = vld [vmem:[%s2243_s16 + $0xc8] sm:$0xff] }
 0x5b8   :  { %v635_v3 = vsel %vm634_vm4, %v1323_v58, %v631_v63  ;;  %v940_v58 = vld [vmem:[%s2243_s16 + $0x150] sm:$0xff]  ;;  %v939_v63 = vld [vmem:[%s2243_s16 + $0x148] sm:$0xff] }
 0x5b9   :  { %v646_v5 = vmul.f32 %v635_v3, %v1627_v27  ;;  %v681_v27 = vld [vmem:[%s2241_s14 + $0xb8] sm:$0xff] }
 0x5ba   :  { %v557_v6 = vpop.f32.mrf.mxu2  ;;  %888 = vmatpush.msrb.mxu3 %v681_v27  ;;  %v918_v27 = vld [vmem:[%s2243_s16 + $0xa0] sm:$0xff] }
 0x5bb   :  { %v651_v7 = vmul.f32 %v1686_v2, %v646_v5  ;;  %560 = vst.msk [vmem:[#allocation4 + $0x8] sm:$0xff] %vm67_vm0, %v557_v6  ;;  %v906_v5 = vld [vmem:[%s2243_s16 + $0x40] sm:$0xff] }
 0x5bc   :  { %889 = vmatpush.msrb.mxu3 %v673_v0  ;;  %v922_v6 = vld [vmem:[%s2243_s16 + $0xc0] sm:$0xff] }
 0x5bd   :  { %v1697_v8 = vadd.f32 %v1691_v4, %v651_v7  ;;  %v938_v7 = vld [vmem:[%s2243_s16 + $0x140] sm:$0xff] }
 0x5be   :  { %890 = vmatpush.msrb.mxu3 %v665_v34  ;;  %v949_v34 = vld [vmem:[%s2243_s16 + $0x198] sm:$0xff] }
 0x5bf   :  { %1273 = vmatmul.msk.f32.vlgmr.msra.gmra.mxu0 %vm67_vm0, %v1697_v8  ;;  %1275 = vmatmul.msk.f32.vlgmr.msrb.gmra.mxu1 %vm67_vm0, %v1697_v8 }
 0x5c0   :  { %1277 = vmatmul.msk.f32.vlgmr.msrb.gmra.mxu2 %vm67_vm0, %v1697_v8 }
 0x5c1   :  { %1076 = vmatpush.msrb.mxu2 %v945_v37 }
 0x5c2   :  { %v562_v9 = vld [vmem:[#allocation4 + $0x8] sm:$0xff] }
 0x5c3   :  { %1272 = vmatmul.msk.f32.gmra.mxu3 %vm67_vm0, %v562_v9  ;;  %1077 = vmatpush.msrb.mxu2 %v944_v41  ;;  %v954_v9 = vld [vmem:[%s2243_s16 + $0x1c0] sm:$0xff]  ;;  %v915_v41 = vld [vmem:[%s2243_s16 + $0x88] sm:$0xff] }
 0x5c5   :  { %1078 = vmatpush.msrb.mxu2 %v943_v45  ;;  %v898_v45 = vld [vmem:[%s2243_s16] sm:$0xff] }
 0x5c7   :  { %1079 = vmatpush.msrb.mxu2 %v942_v49  ;;  %v946_v49 = vld [vmem:[%s2243_s16 + $0x180] sm:$0xff] }
 0x5c9   :  { %1080 = vmatpush.msrb.mxu2 %v941_v53 }
 0x5cb   :  { %1279 = vmatmul.msk.f32.vlgmr.msra.gmra.mxu3 %vm67_vm0, %v1697_v8  ;;  %1081 = vmatpush.msrb.mxu2 %v940_v58  ;;  %v1024_v58 = vld [vmem:[%s2243_s16 + $0x3f0] sm:$0xff] }
 0x5cc   :  { %1099 = vmatpush.msra.mxu3 %v961_v38  ;;  %v932_v38 = vld [vmem:[%s2243_s16 + $0x110] sm:$0xff] }
 0x5cd   :  { %1082 = vmatpush.msrb.mxu2 %v939_v63  ;;  %v974_v63 = vld [vmem:[%s2243_s16 + $0x260] sm:$0xff] }
 0x5ce   :  { %1100 = vmatpush.msra.mxu3 %v960_v42 }
 0x5cf   :  { %1083 = vmatpush.msrb.mxu2 %v938_v7  ;;  %v989_v7 = vld [vmem:[%s2243_s16 + $0x2d8] sm:$0xff] }
 0x5d0   :  { %1101 = vmatpush.msra.mxu3 %v959_v46  ;;  %v914_v46 = vld [vmem:[%s2243_s16 + $0x80] sm:$0xff] }
 0x5d2   :  { %1102 = vmatpush.msra.mxu3 %v958_v50 }
 0x5d4   :  { %1103 = vmatpush.msra.mxu3 %v957_v54  ;;  %v977_v54 = vld [vmem:[%s2243_s16 + $0x278] sm:$0xff] }
 0x5d6   :  { %1104 = vmatpush.msra.mxu3 %v956_v59  ;;  %v991_v59 = vld [vmem:[%s2243_s16 + $0x2e8] sm:$0xff] }
 0x646   :  { %v597_v11 = vpop.f32.mrf.mxu3 }
 0x647   :  { %v598_v12 = vadd.f32 %v1616_v16, %v597_v11  ;;  %v687_v16 = vld [vmem:[%s2241_s14 + $0xe8] sm:$0xff]  ;;  %v905_v11 = vld [vmem:[%s2243_s16 + $0x38] sm:$0xff] }
 0x648   :  { %841 = vmatpush.msra.mxu1 %v687_v16  ;;  %v903_v16 = vld [vmem:[%s2243_s16 + $0x28] sm:$0xff] }
 0x649   :  { %v1710_v13 = vadd.f32 %v598_v12, %v1494_v1  ;;  %v686_v1 = vld [vmem:[%s2241_s14 + $0xe0] sm:$0xff]  ;;  %v921_v12 = vld [vmem:[%s2243_s16 + $0xb8] sm:$0xff] }
 0x64a   :  { %818 = vmatpush.msrb.mxu0 %v686_v1  ;;  %842 = vmatpush.msra.mxu1 %v679_v25  ;;  %v952_v1 = vld [vmem:[%s2243_s16 + $0x1b0] sm:$0xff] }
 0x64b   :  { %v607_v14 = vsel %vm67_vm0, %v1710_v13, 0.0 }
 0x64c   :  { %608 = vadd.xlane.f32.xlu0 %v607_v14  ;;  %819 = vmatpush.msrb.mxu0 %v678_v24  ;;  %v937_v14 = vld [vmem:[%s2243_s16 + $0x138] sm:$0xff]  ;;  %v951_v24 = vld [vmem:[%s2243_s16 + $0x1a8] sm:$0xff] }
 0x64d   :  { %843 = vmatpush.msra.mxu1 %v671_v29  ;;  %1084 = vmatpush.msrb.mxu2 %v937_v14  ;;  %v934_v29 = vld [vmem:[%s2243_s16 + $0x120] sm:$0xff]  ;;  %v1021_v14 = vld [vmem:[%s2243_s16 + $0x3d8] sm:$0xff] }
 0x64e   :  { %820 = vmatpush.msrb.mxu0 %v670_v28 }
 0x64f   :  { %844 = vmatpush.msra.mxu1 %v663_v32  ;;  %v917_v32 = vld [vmem:[%s2243_s16 + $0x98] sm:$0xff] }
 0x650   :  { %821 = vmatpush.msrb.mxu0 %v662_v31  ;;  %v901_v31 = vld [vmem:[%s2243_s16 + $0x18] sm:$0xff] }
 0x651   :  { %1053 = vmatpush.msrb.mxu1 %v929_v36  ;;  %v916_v36 = vld [vmem:[%s2243_s16 + $0x90] sm:$0xff] }
 0x652   :  { %1030 = vmatpush.msra.mxu0 %v913_v35  ;;  %v900_v35 = vld [vmem:[%s2243_s16 + $0x10] sm:$0xff] }
 0x653   :  { %1054 = vmatpush.msrb.mxu1 %v928_v40  ;;  %v899_v40 = vld [vmem:[%s2243_s16 + $0x8] sm:$0xff] }
 0x654   :  { %1031 = vmatpush.msra.mxu0 %v912_v39  ;;  %v948_v39 = vld [vmem:[%s2243_s16 + $0x190] sm:$0xff] }
 0x655   :  { %1055 = vmatpush.msrb.mxu1 %v927_v44  ;;  %v947_v44 = vld [vmem:[%s2243_s16 + $0x188] sm:$0xff] }
 0x656   :  { %1032 = vmatpush.msra.mxu0 %v911_v43  ;;  %v931_v43 = vld [vmem:[%s2243_s16 + $0x108] sm:$0xff] }
 0x657   :  { %1056 = vmatpush.msrb.mxu1 %v926_v48  ;;  %v930_v48 = vld [vmem:[%s2243_s16 + $0x100] sm:$0xff] }
 0x658   :  { %1033 = vmatpush.msra.mxu0 %v910_v47 }
 0x659   :  { %1057 = vmatpush.msrb.mxu1 %v925_v52 }
 0x65a   :  { %1034 = vmatpush.msra.mxu0 %v909_v51 }
 0x65b   :  { %1058 = vmatpush.msrb.mxu1 %v924_v56  ;;  %v992_v56 = vld [vmem:[%s2243_s16 + $0x2f0] sm:$0xff] }
 0x65c   :  { %1035 = vmatpush.msra.mxu0 %v908_v55  ;;  %v976_v55 = vld [vmem:[%s2243_s16 + $0x270] sm:$0xff] }
 0x65d   :  { %1059 = vmatpush.msrb.mxu1 %v923_v62  ;;  %v2022_v62 = vld [vmem:[%s2242_s15] sm:$0xff]  ;;  %s1224_s15 = sshll.u32 %s2245_s18, 4  ;;  %s1225_s15 = int_to_ptr.hbm [resolvable:$true] %s1224_s15 }
 0x65e   :  { %1036 = vmatpush.msra.mxu0 %v907_v61  ;;  %v1023_v61 = vld [vmem:[%s2243_s16 + $0x3e8] sm:$0xff] }
 0x65f   :  { %1060 = vmatpush.msrb.mxu1 %v922_v6  ;;  %v973_v6 = vld [vmem:[%s2243_s16 + $0x258] sm:$0xff] }
 0x660   :  { %1037 = vmatpush.msra.mxu0 %v906_v5  ;;  %v1022_v5 = vld [vmem:[%s2243_s16 + $0x3e0] sm:$0xff] }
 0x661   :  { %1061 = vmatpush.msrb.mxu1 %v921_v12  ;;  %v1005_v12 = vld [vmem:[%s2243_s16 + $0x358] sm:$0xff] }
 0x662   :  { %1038 = vmatpush.msra.mxu0 %v905_v11  ;;  %v693_v11 = vperm.slane %v2022_v62, 1 }
 0x6bf   :  { %v609_v15 = vpop.xlane.xlu0 %608 }
 0x6c0   :  { %v611_v17 = vmul.f32 %v609_v15, %v1500_v10  ;;  %v953_v15 = vld [vmem:[%s2243_s16 + $0x1b8] sm:$0xff] }
 0x6c2   :  { %v1716_v18 = vsub.f32 %v1710_v13, %v611_v17  ;;  %v904_v17 = vld [vmem:[%s2243_s16 + $0x30] sm:$0xff] }
 0x6c3   :  { %1039 = vmatpush.msra.mxu0 %v904_v17  ;;  %v754_v17 = vpop.f32.mrf.mxu1 }
 0x6c4   :  { %v615_v19 = vmul.f32 %v1716_v18, %v1716_v18 }
 0x6c5   :  { %1040 = vmatpush.msra.mxu0 %v903_v16  ;;  %v988_v16 = vld [vmem:[%s2243_s16 + $0x2d0] sm:$0xff] }
 0x6c6   :  { %v619_v20 = vsel %vm67_vm0, %v615_v19, 0.0  ;;  %v920_v19 = vld [vmem:[%s2243_s16 + $0xb0] sm:$0xff] }
 0x6c7   :  { %620 = vadd.xlane.f32.xlu0 %v619_v20  ;;  %v936_v20 = vld [vmem:[%s2243_s16 + $0x130] sm:$0xff]  ;;  %1062 = vmatpush.msrb.mxu1 %v920_v19  ;;  %v694_v19 = vperm.slane %v2022_v62, 2 }
 0x6c8   :  { %1085 = vmatpush.msrb.mxu2 %v936_v20  ;;  %1041 = vmatpush.msra.mxu0 %v902_v26  ;;  %v695_v20 = vperm.slane %v2022_v62, 3 }
 0x6c9   :  { %1063 = vmatpush.msrb.mxu1 %v919_v22  ;;  %v777_v22 = vpop.f32.mrf.mxu2 }
 0x6ca   :  { %1086 = vmatpush.msrb.mxu2 %v935_v23  ;;  %1042 = vmatpush.msra.mxu0 %v901_v31  ;;  %v800_v23 = vpop.f32.mrf.mxu3  ;;  %v1003_v31 = vld [vmem:[%s2243_s16 + $0x348] sm:$0xff] }
 0x6cb   :  { %1064 = vmatpush.msrb.mxu1 %v918_v27  ;;  %v755_v27 = vadd.f32 %v754_v17, %v693_v11 }
 0x6cc   :  { %1087 = vmatpush.msrb.mxu2 %v934_v29  ;;  %1043 = vmatpush.msra.mxu0 %v900_v35  ;;  %v801_v29 = vadd.f32 %v800_v23, %v695_v20  ;;  %v969_v35 = vld [vmem:[%s2243_s16 + $0x238] sm:$0xff] }
 0x6cd   :  { %1065 = vmatpush.msrb.mxu1 %v917_v32  ;;  %v1019_v32 = vld [vmem:[%s2243_s16 + $0x3c8] sm:$0xff] }
 0x6ce   :  { %1088 = vmatpush.msrb.mxu2 %v933_v33  ;;  %1044 = vmatpush.msra.mxu0 %v899_v40  ;;  %v970_v33 = vld [vmem:[%s2243_s16 + $0x240] sm:$0xff]  ;;  %v983_v40 = vld [vmem:[%s2243_s16 + $0x2a8] sm:$0xff] }
 0x6cf   :  { %1066 = vmatpush.msrb.mxu1 %v916_v36  ;;  %v985_v36 = vld [vmem:[%s2243_s16 + $0x2b8] sm:$0xff] }
 0x6d0   :  { %1089 = vmatpush.msrb.mxu2 %v932_v38  ;;  %1045 = vmatpush.msra.mxu0 %v898_v45  ;;  %v984_v38 = vld [vmem:[%s2243_s16 + $0x2b0] sm:$0xff]  ;;  %v1001_v45 = vld [vmem:[%s2243_s16 + $0x338] sm:$0xff] }
 0x6d1   :  { %1067 = vmatpush.msrb.mxu1 %v915_v41  ;;  %v1002_v41 = vld [vmem:[%s2243_s16 + $0x340] sm:$0xff] }
 0x6d2   :  { %1090 = vmatpush.msrb.mxu2 %v931_v43  ;;  %v966_v43 = vld [vmem:[%s2243_s16 + $0x220] sm:$0xff] }
 0x6d3   :  { %1068 = vmatpush.msrb.mxu1 %v914_v46  ;;  %v1017_v46 = vld [vmem:[%s2243_s16 + $0x3b8] sm:$0xff] }
 0x6d4   :  { %1091 = vmatpush.msrb.mxu2 %v930_v48  ;;  %v981_v48 = vld [vmem:[%s2243_s16 + $0x298] sm:$0xff] }
 0x73a   :  { %v621_v57 = vpop.xlane.xlu0 %620 }
 0x73b   :  { %v623_v60 = vmul.f32 %v621_v57, %v1500_v10  ;;  %v955_v10 = vld [vmem:[%s2243_s16 + $0x1c8] sm:$0xff]  ;;  %v1008_v57 = vld [vmem:[%s2243_s16 + $0x370] sm:$0xff] }
 0x73c   :  { %1105 = vmatpush.msra.mxu3 %v955_v10  ;;  %v990_v10 = vld [vmem:[%s2243_s16 + $0x2e0] sm:$0xff] }
 0x73d   :  { %v1854_v3 = vadd.f32 1e-05, %v623_v60  ;;  %v1007_v60 = vld [vmem:[%s2243_s16 + $0x368] sm:$0xff] }
 0x73e   :  { %1106 = vmatpush.msra.mxu3 %v954_v9  ;;  %v692_v9 = vperm.slane %v2022_v62, 0 }
 0x73f   :  { %1324 = vrsqrt.f32 %v1854_v3  ;;  %vm642_vm6 = vweird.f32 %v1854_v3 }
 0x740   :  { %1107 = vmatpush.msra.mxu3 %v953_v15  ;;  %v731_v15 = vpop.f32.mrf.mxu0 }
 0x741   :  { %v732_v26 = vadd.f32 %v731_v15, %v692_v9  ;;  %v697_v15 = vperm.slane %v2022_v62, 5 }
 0x742   :  { %1108 = vmatpush.msra.mxu3 %v952_v1  ;;  %v972_v1 = vld [vmem:[%s2243_s16 + $0x250] sm:$0xff] }
 0x744   :  { %1109 = vmatpush.msra.mxu3 %v951_v24  ;;  %v1004_v24 = vld [vmem:[%s2243_s16 + $0x350] sm:$0xff] }
 0x745   :  { %v1325_v25 = vpop.eup %1324 }
 0x746   :  { %v637_v28 = vmul.f32 %v1325_v25, %v1854_v3  ;;  %1110 = vmatpush.msra.mxu3 %v950_v30  ;;  %vm643_vm5 = vweird.f32 %v1325_v25  ;;  %v1006_v3 = vld [vmem:[%s2243_s16 + $0x360] sm:$0xff]  ;;  %v971_v30 = vld [vmem:[%s2243_s16 + $0x248] sm:$0xff] }
 0x747   :  { %vm644_vm7 = vmor %vm642_vm6, %vm643_vm5 }
 0x748   :  { %v638_v0 = vmul.f32 %v1325_v25, %v637_v28  ;;  %1111 = vmatpush.msra.mxu3 %v949_v34  ;;  %v778_v28 = vadd.f32 %v777_v22, %v694_v19  ;;  %v986_v34 = vld [vmem:[%s2243_s16 + $0x2c0] sm:$0xff] }
 0x74a   :  { %v639_v37 = vmul.f32 0.5, %v638_v0  ;;  %1112 = vmatpush.msra.mxu3 %v948_v39  ;;  %v987_v0 = vld [vmem:[%s2243_s16 + $0x2c8] sm:$0xff] }
 0x74b   :  { %v967_v39 = vld [vmem:[%s2243_s16 + $0x228] sm:$0xff] }
 0x74c   :  { %v640_v42 = vsub.f32 1.5, %v639_v37  ;;  %1113 = vmatpush.msra.mxu3 %v947_v44  ;;  %v968_v37 = vld [vmem:[%s2243_s16 + $0x230] sm:$0xff]  ;;  %v982_v44 = vld [vmem:[%s2243_s16 + $0x2a0] sm:$0xff] }
 0x74e   :  { %v641_v47 = vmul.f32 %v1325_v25, %v640_v42  ;;  %1114 = vmatpush.msra.mxu3 %v946_v49  ;;  %v1018_v42 = vld [vmem:[%s2243_s16 + $0x3c0] sm:$0xff]  ;;  %v1000_v49 = vld [vmem:[%s2243_s16 + $0x330] sm:$0xff] }
 0x750   :  { %v645_v50 = vsel %vm644_vm7, %v1325_v25, %v641_v47  ;;  %v1020_v25 = vld [vmem:[%s2243_s16 + $0x3d0] sm:$0xff]  ;;  %v965_v47 = vld [vmem:[%s2243_s16 + $0x218] sm:$0xff] }
 0x751   :  { %v647_v51 = vmul.f32 %v645_v50, %v1716_v18  ;;  %v993_v18 = vld [vmem:[%s2243_s16 + $0x2f8] sm:$0xff]  ;;  %v1016_v50 = vld [vmem:[%s2243_s16 + $0x3b0] sm:$0xff] }
 0x753   :  { %v652_v52 = vmul.f32 %v1686_v2, %v647_v51  ;;  %v1009_v2 = vld [vmem:[%s2243_s16 + $0x378] sm:$0xff]  ;;  %v964_v51 = vld [vmem:[%s2243_s16 + $0x210] sm:$0xff] }
 0x755   :  { %v657_v53 = vadd.f32 %v1691_v4, %v652_v52  ;;  %v1025_v4 = vld [vmem:[%s2243_s16 + $0x3f8] sm:$0xff]  ;;  %v980_v52 = vld [vmem:[%s2243_s16 + $0x290] sm:$0xff] }
 0x757   :  { %1274 = vmatmul.msk.f32.gmra.mxu0 %vm67_vm0, %v657_v53  ;;  %1276 = vmatmul.msk.f32.gmra.mxu1 %vm67_vm0, %v657_v53 }
 0x758   :  { %1278 = vmatmul.msk.f32.gmra.mxu2 %vm67_vm0, %v657_v53  ;;  %1280 = vmatmul.msk.f32.gmra.mxu3 %vm67_vm0, %v657_v53 }
 0x75f   :  { %1281 = vmatmul.msk.f32.vlgmr.msrb.gmra.mxu0 %vm67_vm0, %v1697_v8  ;;  %1283 = vmatmul.msk.f32.vlgmr.msra.gmra.mxu1 %vm67_vm0, %v1697_v8 }
 0x760   :  { %1285 = vmatmul.msk.f32.vlgmr.msra.gmra.mxu2 %vm67_vm0, %v1697_v8  ;;  %1287 = vmatmul.msk.f32.vlgmr.msrb.gmra.mxu3 %vm67_vm0, %v1697_v8  ;;  %v975_v8 = vld [vmem:[%s2243_s16 + $0x268] sm:$0xff] }
 0x761   :  { %1122 = vmatpush.msrb.mxu0 %v977_v54  ;;  %1145 = vmatpush.msra.mxu1 %v993_v18  ;;  %v1015_v54 = vld [vmem:[%s2243_s16 + $0x3a8] sm:$0xff] }
 0x762   :  { %1168 = vmatpush.msra.mxu2 %v1009_v2  ;;  %1191 = vmatpush.msrb.mxu3 %v1025_v4  ;;  %v963_v18 = vld [vmem:[%s2243_s16 + $0x208] sm:$0xff]  ;;  %v998_v4 = vld [vmem:[%s2243_s16 + $0x320] sm:$0xff] }
 0x763   :  { %1123 = vmatpush.msrb.mxu0 %v976_v55  ;;  %1146 = vmatpush.msra.mxu1 %v992_v56  ;;  %v979_v2 = vld [vmem:[%s2243_s16 + $0x288] sm:$0xff]  ;;  %v1014_v55 = vld [vmem:[%s2243_s16 + $0x3a0] sm:$0xff] }
 0x764   :  { %1169 = vmatpush.msra.mxu2 %v1008_v57  ;;  %1192 = vmatpush.msrb.mxu3 %v1024_v58  ;;  %v962_v56 = vld [vmem:[%s2243_s16 + $0x200] sm:$0xff]  ;;  %v997_v58 = vld [vmem:[%s2243_s16 + $0x318] sm:$0xff] }
 0x765   :  { %1124 = vmatpush.msrb.mxu0 %v975_v8  ;;  %1147 = vmatpush.msra.mxu1 %v991_v59  ;;  %v978_v57 = vld [vmem:[%s2243_s16 + $0x280] sm:$0xff]  ;;  %v1013_v8 = vld [vmem:[%s2243_s16 + $0x398] sm:$0xff]  ;;  %v996_v59 = vld [vmem:[%s2243_s16 + $0x310] sm:$0xff] }
 0x766   :  { %1170 = vmatpush.msra.mxu2 %v1007_v60  ;;  %1193 = vmatpush.msrb.mxu3 %v1023_v61  ;;  %v1012_v60 = vld [vmem:[%s2243_s16 + $0x390] sm:$0xff]  ;;  %v995_v61 = vld [vmem:[%s2243_s16 + $0x308] sm:$0xff] }
 0x767   :  { %1282 = vmatmul.msk.f32.gmra.mxu0 %vm67_vm0, %v657_v53  ;;  %1284 = vmatmul.msk.f32.gmra.mxu1 %vm67_vm0, %v657_v53 }
 0x768   :  { %1286 = vmatmul.msk.f32.gmra.mxu2 %vm67_vm0, %v657_v53  ;;  %1288 = vmatmul.msk.f32.gmra.mxu3 %vm67_vm0, %v657_v53  ;;  %v999_v53 = vld [vmem:[%s2243_s16 + $0x328] sm:$0xff] }
 0x769   :  { %1125 = vmatpush.msrb.mxu0 %v974_v63  ;;  %1148 = vmatpush.msra.mxu1 %v990_v10  ;;  %v1011_v63 = vld [vmem:[%s2243_s16 + $0x388] sm:$0xff]  ;;  %v994_v10 = vld [vmem:[%s2243_s16 + $0x300] sm:$0xff] }
 0x76a   :  { %1171 = vmatpush.msra.mxu2 %v1006_v3  ;;  %1194 = vmatpush.msrb.mxu3 %v1022_v5  ;;  %v1010_v3 = vld [vmem:[%s2243_s16 + $0x380] sm:$0xff]  ;;  %s1382_s16 = smov [#allocation7]  }
 0x76b   :  { %1126 = vmatpush.msrb.mxu0 %v973_v6  ;;  %1149 = vmatpush.msra.mxu1 %v989_v7  ;;  %s1235_s13 = sshll.u32 %s1382_s16, 4  ;;  %s1236_s13 = int_to_ptr.vmem [resolvable:$true] %s1235_s13 }
 0x76c   :  { %1172 = vmatpush.msra.mxu2 %v1005_v12  ;;  %1195 = vmatpush.msrb.mxu3 %v1021_v14  ;;  %v696_v14 = vperm.slane %v2022_v62, 4  ;;  %1243 = dma.vmem_to_hbm [thread:$0]  %s1236_s13, 256, %s1238_s6, [#allocation8], %s1383_s8, %s1383_s8, %s1384_s29  }
 0x76d   :  { %1127 = vmatpush.msrb.mxu0 %v972_v1  ;;  %1150 = vmatpush.msra.mxu1 %v988_v16 }
 0x76e   :  { %1173 = vmatpush.msra.mxu2 %v1004_v24  ;;  %1196 = vmatpush.msrb.mxu3 %v1020_v25 }
 0x76f   :  { %1046 = vmatmul.f32.vlgmr.msra.gmra.mxu0 %v732_v26  ;;  %1069 = vmatmul.f32.vlgmr.msrb.gmra.mxu1 %v755_v27  ;;  %v699_v26 = vperm.slane %v2022_v62, 7 }
 0x770   :  { %1092 = vmatmul.f32.vlgmr.msrb.gmra.mxu2 %v778_v28  ;;  %1115 = vmatmul.f32.vlgmr.msra.gmra.mxu3 %v801_v29 }
 0x771   :  { %1128 = vmatpush.msrb.mxu0 %v971_v30  ;;  %1151 = vmatpush.msra.mxu1 %v987_v0 }
 0x772   :  { %1174 = vmatpush.msra.mxu2 %v1003_v31  ;;  %1197 = vmatpush.msrb.mxu3 %v1019_v32 }
 0x773   :  { %1129 = vmatpush.msrb.mxu0 %v970_v33  ;;  %1152 = vmatpush.msra.mxu1 %v986_v34 }
 0x774   :  { %1175 = vmatpush.msra.mxu2 %v1002_v41  ;;  %1198 = vmatpush.msrb.mxu3 %v1018_v42 }
 0x775   :  { %1130 = vmatpush.msrb.mxu0 %v969_v35  ;;  %1153 = vmatpush.msra.mxu1 %v985_v36 }
 0x776   :  { %1176 = vmatpush.msra.mxu2 %v1001_v45  ;;  %1199 = vmatpush.msrb.mxu3 %v1017_v46 }
 0x777   :  { %1131 = vmatpush.msrb.mxu0 %v968_v37  ;;  %1154 = vmatpush.msra.mxu1 %v984_v38  ;;  %v1307_v37 = vld [vmem:[%s2244_s17] ss:$0 sm:$0xff]  ;;  %s1385_s17 = smov [#allocation5]  }
 0x778   :  { %1177 = vmatpush.msra.mxu2 %v1000_v49  ;;  %1200 = vmatpush.msrb.mxu3 %v1016_v50  ;;  %s1222_s19 = sshll.u32 %s1385_s17, 4  ;;  %s1223_s19 = int_to_ptr.vmem [resolvable:$true] %s1222_s19 }
 0x779   :  { %1132 = vmatpush.msrb.mxu0 %v967_v39  ;;  %1155 = vmatpush.msra.mxu1 %v983_v40 }
 0x77a   :  { %1178 = vmatpush.msra.mxu2 %v999_v53  ;;  %1201 = vmatpush.msrb.mxu3 %v1015_v54 }
 0x77b   :  { %1133 = vmatpush.msrb.mxu0 %v966_v43  ;;  %1156 = vmatpush.msra.mxu1 %v982_v44 }
 0x77c   :  { %1179 = vmatpush.msra.mxu2 %v998_v4  ;;  %1202 = vmatpush.msrb.mxu3 %v1014_v55 }
 0x77d   :  { %1134 = vmatpush.msrb.mxu0 %v965_v47  ;;  %1157 = vmatpush.msra.mxu1 %v981_v48 }
 0x77e   :  { %1180 = vmatpush.msra.mxu2 %v997_v58  ;;  %1203 = vmatpush.msrb.mxu3 %v1013_v8 }
 0x77f   :  { %1135 = vmatpush.msrb.mxu0 %v964_v51  ;;  %1158 = vmatpush.msra.mxu1 %v980_v52 }
 0x780   :  { %1181 = vmatpush.msra.mxu2 %v996_v59  ;;  %1204 = vmatpush.msrb.mxu3 %v1012_v60 }
 0x781   :  { %1136 = vmatpush.msrb.mxu0 %v963_v18  ;;  %1159 = vmatpush.msra.mxu1 %v979_v2 }
 0x782   :  { %1182 = vmatpush.msra.mxu2 %v995_v61  ;;  %1205 = vmatpush.msrb.mxu3 %v1011_v63 }
 0x783   :  { %1137 = vmatpush.msrb.mxu0 %v962_v56  ;;  %1160 = vmatpush.msra.mxu1 %v978_v57 }
 0x784   :  { %1183 = vmatpush.msra.mxu2 %v994_v10  ;;  %1206 = vmatpush.msrb.mxu3 %v1010_v3 }
 0x7d4   :  { %v734_v5 = vpop.f32.mrf.mxu0  ;;  %v757_v6 = vpop.f32.mrf.mxu1 }
 0x7d5   :  { %v735_v7 = vadd.f32 %v734_v5, %v692_v9  ;;  %v758_v12 = vadd.f32 %v757_v6, %v693_v11  ;;  %v698_v11 = vperm.slane %v2022_v62, 6 }
 0x7d7   :  { %1049 = vmatmul.f32.gmra.mxu0 %v735_v7  ;;  %1072 = vmatmul.f32.gmra.mxu1 %v758_v12 }
 0x7db   :  { %v780_v17 = vpop.f32.mrf.mxu2  ;;  %v803_v1 = vpop.f32.mrf.mxu3 }
 0x7dc   :  { %v781_v16 = vadd.f32 %v780_v17, %v694_v19  ;;  %v804_v22 = vadd.f32 %v803_v1, %v695_v20  ;;  %v823_v23 = vpop.f32.mrf.mxu0  ;;  %v846_v24 = vpop.f32.mrf.mxu1 }
 0x7dd   :  { %v824_v9 = vadd.f32 %v823_v23, %v696_v14  ;;  %v847_v25 = vadd.f32 %v846_v24, %v697_v15 }
 0x7de   :  { %1095 = vmatmul.f32.gmra.mxu2 %v781_v16  ;;  %1118 = vmatmul.f32.gmra.mxu3 %v804_v22 }
 0x7df   :  { %1138 = vmatmul.f32.vlgmr.msrb.gmra.mxu0 %v824_v9  ;;  %1161 = vmatmul.f32.vlgmr.msra.gmra.mxu1 %v847_v25 }
 0x7e3   :  { %v869_v27 = vpop.f32.mrf.mxu2  ;;  %v892_v28 = vpop.f32.mrf.mxu3 }
 0x7e4   :  { %v870_v29 = vadd.f32 %v869_v27, %v698_v11  ;;  %v893_v30 = vadd.f32 %v892_v28, %v699_v26  ;;  %v826_v19 = vpop.f32.mrf.mxu0  ;;  %v849_v0 = vpop.f32.mrf.mxu1 }
 0x7e5   :  { %v827_v31 = vadd.f32 %v826_v19, %v696_v14  ;;  %v850_v20 = vadd.f32 %v849_v0, %v697_v15 }
 0x7e6   :  { %1184 = vmatmul.f32.vlgmr.msra.gmra.mxu2 %v870_v29  ;;  %1207 = vmatmul.f32.vlgmr.msrb.gmra.mxu3 %v893_v30 }
 0x7e7   :  { %1141 = vmatmul.f32.gmra.mxu0 %v827_v31  ;;  %1164 = vmatmul.f32.gmra.mxu1 %v850_v20 }
 0x7eb   :  { %v872_v32 = vpop.f32.mrf.mxu2  ;;  %v895_v33 = vpop.f32.mrf.mxu3 }
 0x7ec   :  { %v873_v34 = vadd.f32 %v872_v32, %v698_v11  ;;  %v896_v35 = vadd.f32 %v895_v33, %v699_v26  ;;  %v1047_v62 = vpop.f32.mrf.mxu0  ;;  %v1070_v36 = vpop.f32.mrf.mxu1 }
 0x7ed   :  { %v1048_v39 = vadd.f32 %v1307_v37, %v1047_v62 }
 0x7ee   :  { %1187 = vmatmul.f32.gmra.mxu2 %v873_v34  ;;  %1210 = vmatmul.f32.gmra.mxu3 %v896_v35 }
 0x7ef   :  { %v1071_v43 = vadd.f32 %v1070_v36, %v1048_v39 }
 0x7f3   :  { %v1093_v40 = vpop.f32.mrf.mxu2  ;;  %v1116_v41 = vpop.f32.mrf.mxu3 }
 0x7f4   :  { %v1094_v44 = vadd.f32 %v1093_v40, %v1071_v43 }
 0x7f6   :  { %v1117_v49 = vadd.f32 %v1116_v41, %v1094_v44 }
 0x854   :  { %v1050_v38 = vpop.f32.mrf.mxu0  ;;  %v1073_v42 = vpop.f32.mrf.mxu1 }
 0x855   :  { %v1051_v45 = vadd.f32 %v1307_v37, %v1050_v38 }
 0x857   :  { %v1074_v50 = vadd.f32 %v1073_v42, %v1051_v45 }
 0x85c   :  { %v1139_v46 = vpop.f32.mrf.mxu0  ;;  %v1162_v53 = vpop.f32.mrf.mxu1 }
 0x85d   :  { %v1140_v51 = vadd.f32 %v1139_v46, %v1117_v49 }
 0x85f   :  { %v1163_v54 = vadd.f32 %v1162_v53, %v1140_v51 }
 0x861   :  { %v1096_v47 = vpop.f32.mrf.mxu2  ;;  %v1119_v48 = vpop.f32.mrf.mxu3 }
 0x862   :  { %v1097_v52 = vadd.f32 %v1096_v47, %v1074_v50 }
 0x864   :  { %v1120_v18 = vadd.f32 %v1119_v48, %v1097_v52  ;;  %v1142_v2 = vpop.f32.mrf.mxu0  ;;  %v1165_v59 = vpop.f32.mrf.mxu1 }
 0x866   :  { %v1143_v57 = vadd.f32 %v1142_v2, %v1120_v18 }
 0x868   :  { %v1166_v60 = vadd.f32 %v1165_v59, %v1143_v57 }
 0x869   :  { %v1185_v4 = vpop.f32.mrf.mxu2  ;;  %v1208_v55 = vpop.f32.mrf.mxu3 }
 0x86a   :  { %v1186_v56 = vadd.f32 %v1185_v4, %v1163_v54 }
 0x86c   :  { %v1209_v58 = vadd.f32 %v1208_v55, %v1186_v56 }
 0x86e   :  { %v1214_v8 = vadd.f32 %v1209_v58, %v1621_v21 }
 0x870   :  { %1216 = vst.msk [vmem:[#allocation5] sm:$0xff] %vm67_vm0, %v1214_v8 }
 0x871   :  { %v1188_v61 = vpop.f32.mrf.mxu2  ;;  %v1211_v10 = vpop.f32.mrf.mxu3 }
 0x872   :  { %v1189_v63 = vadd.f32 %v1188_v61, %v1166_v60 }
 0x874   :  { %v1212_v3 = vadd.f32 %v1211_v10, %v1189_v63 }
 0x876   :  { %v1215_v5 = vadd.f32 %v1212_v3, %v1710_v13 }
 0x878   :  { %1217 = vst.msk [vmem:[#allocation5 + $0x8] sm:$0xff] %vm67_vm0, %v1215_v5 }
 0x879   :  { %1230 = dma.vmem_to_hbm [thread:$0]  %s1223_s19, 256, %s1225_s15, [#allocation6], %s1383_s8, %s1383_s8, %s1384_s29  }
 0x87a   :  { %1374 = dma.done.wait [#allocation6], 256  }
 0x87b   :  { %1375 = vsyncadd [#allocation6], 4294967040 }
 0x87c   :  { %1376 = dma.done.wait [#allocation8], 256  }
 0x87d   :  { %1377 = vsyncadd [#allocation8], 4294967040 }
 0x87e   :  { %1252 = vsyncpa [#allocation6], 1 }
 0x87f   :  { %1253 = vsyncpa [#allocation8], 1 }

</bundles_post_ra>
